<compile_context>
chip_gen: v6e
topology: v6e:2x2x1
jax: 0.10.0
libtpu: 0.0.40
codegen_flags: <defaults>
</compile_context>

<pallas_src>
import functools

import jax
import jax.numpy as jnp
from jax import lax
from jax.experimental import pallas as pl
from jax.experimental.pallas import tpu as pltpu


# ---------------------------------------------------------------------------
# Helpers
# ---------------------------------------------------------------------------
def _round_up(x, m):
    return (x + m - 1) // m * m


def _vmem_limit(*block_bytes, scratch=0):
    """Scoped-VMEM request: double-buffered blocks + scratch + margin (v7x-safe)."""
    need = 2 * sum(block_bytes) + scratch + (4 << 20)
    return int(min(max(need, 16 << 20), 64 << 20))


# ---------------------------------------------------------------------------
# Pallas kernels
# ---------------------------------------------------------------------------
def _conv_fused_kernel(xf_ref, w1_ref, b1_ref, w2_ref, b2_ref,
                       out_ref, hm_ref, *, P):
    """Per-image fused 3x3 conv (BN folded) -> ReLU -> 1x1 conv -> channel mean.

    xf_ref : (1, C, Lf)   bf16 zero-padded image, spatial flattened row-major
                          over the padded (H+2, W+2) grid; P = W + 2.
    w1_ref : (9, C, C)    bf16, w1[kh*3+kw] = BN-scale-folded tap (c_out, c_in)
    b1_ref : (C, 1)       f32 folded BN bias
    w2_ref : (Cm, C)      bf16 1x1 conv weight,  b2_ref: (Cm, 1) f32 bias
    out_ref: (1, Cm, Nout) f32 conv2 output  (HW on lanes, padded-width layout)
    hm_ref : (1, 1, Nout)  f32 mean over Cm   (input of the Hough stage)
    """
    n_out = out_ref.shape[-1]
    c_in = w1_ref.shape[-1]
    acc = jnp.zeros((c_in, n_out), jnp.float32)
    # 9 shifted (C,C)@(C,Nout) accumulating matmuls; a shift by (kh, kw) in the
    # padded image is a lane offset of kh*P + kw in the flattened layout.
    for k in range(9):
        kh, kw = divmod(k, 3)
        off = kh * P + kw
        xs = xf_ref[0, :, off:off + n_out]                      # (C, Nout) bf16
        acc = acc + jnp.dot(w1_ref[k], xs, preferred_element_type=jnp.float32)
    h = jnp.maximum(acc + b1_ref[...], 0.0)                     # BN bias + ReLU
    out = jnp.dot(w2_ref[...], h.astype(jnp.bfloat16),
                  preferred_element_type=jnp.float32) + b2_ref[...]
    out_ref[0] = out
    hm_ref[0] = jnp.mean(out, axis=0, keepdims=True)


def _dht_fwd_kernel(hm_ref, vote_ref, o_ref, acc_ref):
    """Deep Hough voting: (B, hw_t) @ (hw_t, ar_t), HW reduction (last axis)."""
    k = pl.program_id(1)

    @pl.when(k == 0)
    def _init():
        acc_ref[...] = jnp.zeros_like(acc_ref)

    acc_ref[...] += jnp.dot(hm_ref[...], vote_ref[...],
                            preferred_element_type=jnp.float32)

    @pl.when(k == pl.num_programs(1) - 1)
    def _done():
        o_ref[...] = acc_ref[...]


def _mask_bp_kernel(hg_ref, vote_ref, o_ref, acc_ref, *, inv_scale):
    """Inverse-Hough backprojection + sigmoid; AR reduction (last axis).

    Contracts vote on its LAST dim (A @ V^T) so vote.T is never materialized.
    """
    a = pl.program_id(1)

    @pl.when(a == 0)
    def _init():
        acc_ref[...] = jnp.zeros_like(acc_ref)

    acc_ref[...] += lax.dot_general(
        hg_ref[...], vote_ref[...],
        dimension_numbers=(((1,), (1,)), ((), ())),
        preferred_element_type=jnp.float32)

    @pl.when(a == pl.num_programs(1) - 1)
    def _done():
        o_ref[...] = jax.nn.sigmoid(acc_ref[...] * inv_scale)


# ---------------------------------------------------------------------------
# Vote matrix (Deep Hough) & parameters
# ---------------------------------------------------------------------------
def _build_vote_matrix(H, W, num_angle, num_rho):
    """One-hot vote matrix V: (H*W, A*R); V[hw, a*R + r] = 1 iff pixel votes."""
    ys, xs = jnp.meshgrid(jnp.arange(H), jnp.arange(W), indexing="ij")
    xc = xs.astype(jnp.float32) - (W - 1) / 2.0
    yc = ys.astype(jnp.float32) - (H - 1) / 2.0
    thetas = jnp.arange(num_angle, dtype=jnp.float32) * (jnp.pi / num_angle)
    irho = jnp.sqrt(jnp.float32(H * H + W * W)) / num_rho
    r = (xc[None] * jnp.cos(thetas)[:, None, None]
         + yc[None] * jnp.sin(thetas)[:, None, None])            # (A, H, W)
    # NOTE: the original CUDA C_dht may bin with floor instead of round
    # (possible +/-1 rho-bin difference).
    r_idx = jnp.round(r / irho).astype(jnp.int32) + num_rho // 2
    valid = (r_idx >= 0) & (r_idx < num_rho)
    r_idx = jnp.clip(r_idx, 0, num_rho - 1)
    vote = jax.nn.one_hot(r_idx, num_rho, dtype=jnp.float32)     # (A, H, W, R)
    vote = vote * valid[..., None].astype(jnp.float32)
    vote = vote.transpose(1, 2, 0, 3).reshape(H * W, num_angle * num_rho)
    return vote


def init_params(key, in_channels, mask_out_channels):
    k1, k2, k3 = jax.random.split(key, 3)
    w1 = jax.random.normal(k1, (in_channels, in_channels, 3, 3), jnp.float32) * 0.1
    w2 = jax.random.normal(k2, (mask_out_channels, in_channels, 1, 1), jnp.float32) * 0.1
    b2 = jax.random.normal(k3, (mask_out_channels,), jnp.float32) * 0.1
    return {
        "w1": w1,                                   # conv3x3, bias=False
        "bn_gamma": jnp.ones((in_channels,), jnp.float32),
        "bn_beta": jnp.zeros((in_channels,), jnp.float32),
        "bn_mean": jnp.zeros((in_channels,), jnp.float32),
        "bn_var": jnp.ones((in_channels,), jnp.float32),
        "w2": w2,                                   # 1x1 conv
        "b2": b2,
    }


# ---------------------------------------------------------------------------
# HTMask forward
# ---------------------------------------------------------------------------
def ht_mask_forward(x, params, *, num_angle, num_rho):
    B, C, H, W = x.shape
    Cm = params["w2"].shape[0]
    eps = 1e-5

    # ---- fold BatchNorm (eval mode) into conv1 weights / bias ----
    scale = params["bn_gamma"] / jnp.sqrt(params["bn_var"] + eps)      # (C,)
    bias = params["bn_beta"] - params["bn_mean"] * scale               # (C,)
    w1k = params["w1"].transpose(2, 3, 0, 1).reshape(9, C, C)          # (k, c_out, c_in)
    w1s = (w1k * scale[None, :, None]).astype(jnp.bfloat16)
    b1 = bias.reshape(C, 1).astype(jnp.float32)
    w2r = params["w2"].reshape(Cm, C).astype(jnp.bfloat16)
    b2 = params["b2"].reshape(Cm, 1).astype(jnp.float32)

    # ---- pad + flatten the input: channels on sublanes, spatial on lanes ----
    # (For very large images the spatial axis would additionally be tiled with
    #  a halo; one image per grid step covers typical U-Net feature maps.)
    P = W + 2
    n_out = _round_up(H * P, 128)                 # lane-dense conv output width
    Lf = _round_up(max((H + 2) * P, n_out + 2 * P + 2), 128)
    xpad = jnp.pad(x, ((0, 0), (0, 0), (1, 1), (1, 1))).reshape(B, C, (H + 2) * P)
    xf = jnp.pad(xpad, ((0, 0), (0, 0), (0, Lf - (H + 2) * P))).astype(jnp.bfloat16)

    conv_vmem = _vmem_limit(C * Lf * 2, Cm * n_out * 4, n_out * 4)
    out_pad, hm_pad = pl.pallas_call(
        functools.partial(_conv_fused_kernel, P=P),
        out_shape=(jax.ShapeDtypeStruct((B, Cm, n_out), jnp.float32),
                   jax.ShapeDtypeStruct((B, 1, n_out), jnp.float32)),
        grid=(B,),
        in_specs=[
            pl.BlockSpec((1, C, Lf), lambda b: (b, 0, 0)),
            pl.BlockSpec((9, C, C), lambda b: (0, 0, 0)),
            pl.BlockSpec((C, 1), lambda b: (0, 0)),
            pl.BlockSpec((Cm, C), lambda b: (0, 0)),
            pl.BlockSpec((Cm, 1), lambda b: (0, 0)),
        ],
        out_specs=(pl.BlockSpec((1, Cm, n_out), lambda b: (b, 0, 0)),
                   pl.BlockSpec((1, 1, n_out), lambda b: (b, 0, 0))),
        compiler_params=pltpu.CompilerParams(
            dimension_semantics=("parallel",),
            vmem_limit_bytes=conv_vmem),
    )(xf, w1s, b1, w2r, b2)

    # Returned conv2 output: materialize NCHW exactly once.
    out = out_pad[:, :, :H * P].reshape(B, Cm, H, P)[:, :, :, :W]

    # ---- deep Hough transform (C_dht) on the channel mean ----
    # hough_map is only consumed by the mask generator, whose first step is a
    # channel mean; by linearity  mean_c(C_dht(out)) == C_dht(mean_c(out)).
    HW = H * W
    AR = num_angle * num_rho
    hw_t = min(2048, _round_up(HW, 128))
    ar_t = min(512, _round_up(AR, 128))
    HWp = _round_up(HW, hw_t)
    ARp = _round_up(AR, ar_t)

    hm = hm_pad[:, 0, :H * P].reshape(B, H, P)[:, :, :W].reshape(B, HW)  # tiny
    hm = jnp.pad(hm, ((0, 0), (0, HWp - HW))).astype(jnp.bfloat16)

    vote = _build_vote_matrix(H, W, num_angle, num_rho)                  # (HW, AR)
    vote = jnp.pad(vote, ((0, HWp - HW), (0, ARp - AR))).astype(jnp.bfloat16)

    dht_vmem = _vmem_limit(B * hw_t * 2, hw_t * ar_t * 2, B * ar_t * 4,
                           scratch=B * ar_t * 4)
    hough = pl.pallas_call(
        _dht_fwd_kernel,
        out_shape=jax.ShapeDtypeStruct((B, ARp), jnp.float32),
        grid=(ARp // ar_t, HWp // hw_t),           # HW reduction last
        in_specs=[
            pl.BlockSpec((B, hw_t), lambda a, k: (0, k)),
            pl.BlockSpec((hw_t, ar_t), lambda a, k: (k, a)),
        ],
        out_specs=pl.BlockSpec((B, ar_t), lambda a, k: (0, a)),
        scratch_shapes=[pltpu.VMEM((B, ar_t), jnp.float32)],
        compiler_params=pltpu.CompilerParams(
            dimension_semantics=("parallel", "arbitrary"),
            vmem_limit_bytes=dht_vmem),
    )(hm, vote)

    # ---- DirectionalMaskGenerator (approximation, see TODO at top) ----
    mask_vmem = _vmem_limit(B * ar_t * 2, hw_t * ar_t * 2, B * hw_t * 4,
                            scratch=B * hw_t * 4)
    mask_p = pl.pallas_call(
        functools.partial(_mask_bp_kernel, inv_scale=1.0 / float(num_angle)),
        out_shape=jax.ShapeDtypeStruct((B, HWp), jnp.float32),
        grid=(HWp // hw_t, ARp // ar_t),           # AR reduction last
        in_specs=[
            pl.BlockSpec((B, ar_t), lambda h, a: (0, a)),
            pl.BlockSpec((hw_t, ar_t), lambda h, a: (h, a)),
        ],
        out_specs=pl.BlockSpec((B, hw_t), lambda h, a: (0, h)),
        scratch_shapes=[pltpu.VMEM((B, hw_t), jnp.float32)],
        compiler_params=pltpu.CompilerParams(
            dimension_semantics=("parallel", "arbitrary"),
            vmem_limit_bytes=mask_vmem),
    )(hough.astype(jnp.bfloat16), vote)

    mask = mask_p[:, :HW].reshape(B, 1, H, W)
    mask = jnp.broadcast_to(mask, (B, Cm, H, W))   # == .expand(-1, Cm, -1, -1)
    return mask, out


# ---------------------------------------------------------------------------
# Pure-JAX reference for the conv branch (correctness check)
# ---------------------------------------------------------------------------
def _reference_out(x, params):
    eps = 1e-5
    C = x.shape[1]
    Cm = params["w2"].shape[0]
    scale = params["bn_gamma"] / jnp.sqrt(params["bn_var"] + eps)
    bias = params["bn_beta"] - params["bn_mean"] * scale
    y = lax.conv_general_dilated(x, params["w1"], (1, 1), "SAME",
                                 dimension_numbers=("NCHW", "OIHW", "NCHW"))
    y = jnp.maximum(y * scale[None, :, None, None] + bias[None, :, None, None], 0.0)
    out = jnp.einsum("oc,bchw->bohw", params["w2"].reshape(Cm, C), y)
    return out + params["b2"][None, :, None, None]


# ---------------------------------------------------------------------------
if __name__ == "__main__":
    B = 2
    in_channels = 4
    mask_out_channels = 4
    img_size = 16
    num_angle = 8
    num_rho = 16

    key = jax.random.PRNGKey(0)
    kx, kp = jax.random.split(key)
    x = jax.random.normal(kx, (B, in_channels, img_size, img_size), jnp.float32)
    params = init_params(kp, in_channels, mask_out_channels)

    fwd = jax.jit(
        functools.partial(ht_mask_forward, num_angle=num_angle, num_rho=num_rho)
    )
    mask, out = fwd(x, params)
    jax.block_until_ready((mask, out))

    assert mask.shape == (B, mask_out_channels, img_size, img_size)
    assert out.shape == (B, mask_out_channels, img_size, img_size)
    assert bool(jnp.all(jnp.isfinite(mask))) and bool(jnp.all(jnp.isfinite(out)))
    assert bool(jnp.all((mask >= 0.0) & (mask <= 1.0)))

    ref = _reference_out(x, params)
    err = float(jnp.max(jnp.abs(out - ref)))
    assert err < 5e-2, f"conv branch mismatch vs reference: max|diff|={err}"

    print("KERNEL_OK")
</pallas_src>

<mosaic_0001>
module attributes {stable_mosaic.version = 11 : i64} {
  func.func @_conv_fused_kernel(%arg0: i32, %arg1: memref<1x4x512xbf16, #tpu.memory_space<vmem>>, %arg2: memref<9x4x4xbf16, #tpu.memory_space<vmem>>, %arg3: memref<4x1xf32, #tpu.memory_space<vmem>>, %arg4: memref<4x4xbf16, #tpu.memory_space<vmem>>, %arg5: memref<4x1xf32, #tpu.memory_space<vmem>>, %arg6: memref<1x4x384xf32, #tpu.memory_space<vmem>>, %arg7: memref<1x1x384xf32, #tpu.memory_space<vmem>>) attributes {dimension_semantics = [#tpu.dimension_semantics<parallel>], iteration_bounds = array<i64: 2>, scalar_prefetch = 0 : i64, scratch_operands = 0 : i64, tpu.core_type = #tpu.core_type<tc>, window_params = [{transform_indices = @transform_0, window_bounds = array<i64: 1, 4, 512>}, {pipeline_mode = #tpu.pipeline_mode<synchronous>, transform_indices = @transform_1, window_bounds = array<i64: 9, 4, 4>}, {pipeline_mode = #tpu.pipeline_mode<synchronous>, transform_indices = @transform_2, window_bounds = array<i64: 4, 1>}, {pipeline_mode = #tpu.pipeline_mode<synchronous>, transform_indices = @transform_3, window_bounds = array<i64: 4, 4>}, {pipeline_mode = #tpu.pipeline_mode<synchronous>, transform_indices = @transform_4, window_bounds = array<i64: 4, 1>}, {transform_indices = @transform_5, window_bounds = array<i64: 1, 4, 384>}, {transform_indices = @transform_6, window_bounds = array<i64: 1, 1, 384>}]} {
    %cst = arith.constant 0.000000e+00 : f32
    %0 = vector.broadcast %cst : f32 to vector<4x384xf32>
    %c0 = arith.constant 0 : index
    %c0_0 = arith.constant 0 : index
    %c0_1 = arith.constant 0 : index
    %1 = vector.load %arg1[%c0, %c0_0, %c0_1] : memref<1x4x512xbf16, #tpu.memory_space<vmem>>, vector<1x4x384xbf16>
    %2 = vector.shape_cast %1 : vector<1x4x384xbf16> to vector<4x384xbf16>
    %c0_2 = arith.constant 0 : index
    %c0_3 = arith.constant 0 : index
    %c0_4 = arith.constant 0 : index
    %3 = vector.load %arg2[%c0_2, %c0_3, %c0_4] : memref<9x4x4xbf16, #tpu.memory_space<vmem>>, vector<1x4x4xbf16>
    %4 = vector.shape_cast %3 : vector<1x4x4xbf16> to vector<4x4xbf16>
    %cst_5 = arith.constant dense<0.000000e+00> : vector<4x384xf32>
    %5 = tpu.matmul %4, %2, %cst_5 {dimension_numbers = #tpu.dot_dimension_numbers<[1], [0], [0], [1], [0, 0, 1, 1], [], []>} : vector<4x4xbf16>, vector<4x384xbf16>, vector<4x384xf32> -> vector<4x384xf32>
    %6 = arith.addf %0, %5 : vector<4x384xf32>
    %c0_6 = arith.constant 0 : index
    %c0_7 = arith.constant 0 : index
    %c1 = arith.constant 1 : index
    %7 = vector.load %arg1[%c0_6, %c0_7, %c1] : memref<1x4x512xbf16, #tpu.memory_space<vmem>>, vector<1x4x384xbf16>
    %8 = vector.shape_cast %7 : vector<1x4x384xbf16> to vector<4x384xbf16>
    %c1_8 = arith.constant 1 : index
    %c0_9 = arith.constant 0 : index
    %c0_10 = arith.constant 0 : index
    %9 = vector.load %arg2[%c1_8, %c0_9, %c0_10] : memref<9x4x4xbf16, #tpu.memory_space<vmem>>, vector<1x4x4xbf16>
    %10 = vector.shape_cast %9 : vector<1x4x4xbf16> to vector<4x4xbf16>
    %cst_11 = arith.constant dense<0.000000e+00> : vector<4x384xf32>
    %11 = tpu.matmul %10, %8, %cst_11 {dimension_numbers = #tpu.dot_dimension_numbers<[1], [0], [0], [1], [0, 0, 1, 1], [], []>} : vector<4x4xbf16>, vector<4x384xbf16>, vector<4x384xf32> -> vector<4x384xf32>
    %12 = arith.addf %6, %11 : vector<4x384xf32>
    %c0_12 = arith.constant 0 : index
    %c0_13 = arith.constant 0 : index
    %c2 = arith.constant 2 : index
    %13 = vector.load %arg1[%c0_12, %c0_13, %c2] : memref<1x4x512xbf16, #tpu.memory_space<vmem>>, vector<1x4x384xbf16>
    %14 = vector.shape_cast %13 : vector<1x4x384xbf16> to vector<4x384xbf16>
    %c2_14 = arith.constant 2 : index
    %c0_15 = arith.constant 0 : index
    %c0_16 = arith.constant 0 : index
    %15 = vector.load %arg2[%c2_14, %c0_15, %c0_16] : memref<9x4x4xbf16, #tpu.memory_space<vmem>>, vector<1x4x4xbf16>
    %16 = vector.shape_cast %15 : vector<1x4x4xbf16> to vector<4x4xbf16>
    %cst_17 = arith.constant dense<0.000000e+00> : vector<4x384xf32>
    %17 = tpu.matmul %16, %14, %cst_17 {dimension_numbers = #tpu.dot_dimension_numbers<[1], [0], [0], [1], [0, 0, 1, 1], [], []>} : vector<4x4xbf16>, vector<4x384xbf16>, vector<4x384xf32> -> vector<4x384xf32>
    %18 = arith.addf %12, %17 : vector<4x384xf32>
    %c0_18 = arith.constant 0 : index
    %c0_19 = arith.constant 0 : index
    %c18 = arith.constant 18 : index
    %19 = vector.load %arg1[%c0_18, %c0_19, %c18] : memref<1x4x512xbf16, #tpu.memory_space<vmem>>, vector<1x4x384xbf16>
    %20 = vector.shape_cast %19 : vector<1x4x384xbf16> to vector<4x384xbf16>
    %c3 = arith.constant 3 : index
    %c0_20 = arith.constant 0 : index
    %c0_21 = arith.constant 0 : index
    %21 = vector.load %arg2[%c3, %c0_20, %c0_21] : memref<9x4x4xbf16, #tpu.memory_space<vmem>>, vector<1x4x4xbf16>
    %22 = vector.shape_cast %21 : vector<1x4x4xbf16> to vector<4x4xbf16>
    %cst_22 = arith.constant dense<0.000000e+00> : vector<4x384xf32>
    %23 = tpu.matmul %22, %20, %cst_22 {dimension_numbers = #tpu.dot_dimension_numbers<[1], [0], [0], [1], [0, 0, 1, 1], [], []>} : vector<4x4xbf16>, vector<4x384xbf16>, vector<4x384xf32> -> vector<4x384xf32>
    %24 = arith.addf %18, %23 : vector<4x384xf32>
    %c0_23 = arith.constant 0 : index
    %c0_24 = arith.constant 0 : index
    %c19 = arith.constant 19 : index
    %25 = vector.load %arg1[%c0_23, %c0_24, %c19] : memref<1x4x512xbf16, #tpu.memory_space<vmem>>, vector<1x4x384xbf16>
    %26 = vector.shape_cast %25 : vector<1x4x384xbf16> to vector<4x384xbf16>
    %c4 = arith.constant 4 : index
    %c0_25 = arith.constant 0 : index
    %c0_26 = arith.constant 0 : index
    %27 = vector.load %arg2[%c4, %c0_25, %c0_26] : memref<9x4x4xbf16, #tpu.memory_space<vmem>>, vector<1x4x4xbf16>
    %28 = vector.shape_cast %27 : vector<1x4x4xbf16> to vector<4x4xbf16>
    %cst_27 = arith.constant dense<0.000000e+00> : vector<4x384xf32>
    %29 = tpu.matmul %28, %26, %cst_27 {dimension_numbers = #tpu.dot_dimension_numbers<[1], [0], [0], [1], [0, 0, 1, 1], [], []>} : vector<4x4xbf16>, vector<4x384xbf16>, vector<4x384xf32> -> vector<4x384xf32>
    %30 = arith.addf %24, %29 : vector<4x384xf32>
    %c0_28 = arith.constant 0 : index
    %c0_29 = arith.constant 0 : index
    %c20 = arith.constant 20 : index
    %31 = vector.load %arg1[%c0_28, %c0_29, %c20] : memref<1x4x512xbf16, #tpu.memory_space<vmem>>, vector<1x4x384xbf16>
    %32 = vector.shape_cast %31 : vector<1x4x384xbf16> to vector<4x384xbf16>
    %c5 = arith.constant 5 : index
    %c0_30 = arith.constant 0 : index
    %c0_31 = arith.constant 0 : index
    %33 = vector.load %arg2[%c5, %c0_30, %c0_31] : memref<9x4x4xbf16, #tpu.memory_space<vmem>>, vector<1x4x4xbf16>
    %34 = vector.shape_cast %33 : vector<1x4x4xbf16> to vector<4x4xbf16>
    %cst_32 = arith.constant dense<0.000000e+00> : vector<4x384xf32>
    %35 = tpu.matmul %34, %32, %cst_32 {dimension_numbers = #tpu.dot_dimension_numbers<[1], [0], [0], [1], [0, 0, 1, 1], [], []>} : vector<4x4xbf16>, vector<4x384xbf16>, vector<4x384xf32> -> vector<4x384xf32>
    %36 = arith.addf %30, %35 : vector<4x384xf32>
    %c0_33 = arith.constant 0 : index
    %c0_34 = arith.constant 0 : index
    %c36 = arith.constant 36 : index
    %37 = vector.load %arg1[%c0_33, %c0_34, %c36] : memref<1x4x512xbf16, #tpu.memory_space<vmem>>, vector<1x4x384xbf16>
    %38 = vector.shape_cast %37 : vector<1x4x384xbf16> to vector<4x384xbf16>
    %c6 = arith.constant 6 : index
    %c0_35 = arith.constant 0 : index
    %c0_36 = arith.constant 0 : index
    %39 = vector.load %arg2[%c6, %c0_35, %c0_36] : memref<9x4x4xbf16, #tpu.memory_space<vmem>>, vector<1x4x4xbf16>
    %40 = vector.shape_cast %39 : vector<1x4x4xbf16> to vector<4x4xbf16>
    %cst_37 = arith.constant dense<0.000000e+00> : vector<4x384xf32>
    %41 = tpu.matmul %40, %38, %cst_37 {dimension_numbers = #tpu.dot_dimension_numbers<[1], [0], [0], [1], [0, 0, 1, 1], [], []>} : vector<4x4xbf16>, vector<4x384xbf16>, vector<4x384xf32> -> vector<4x384xf32>
    %42 = arith.addf %36, %41 : vector<4x384xf32>
    %c0_38 = arith.constant 0 : index
    %c0_39 = arith.constant 0 : index
    %c37 = arith.constant 37 : index
    %43 = vector.load %arg1[%c0_38, %c0_39, %c37] : memref<1x4x512xbf16, #tpu.memory_space<vmem>>, vector<1x4x384xbf16>
    %44 = vector.shape_cast %43 : vector<1x4x384xbf16> to vector<4x384xbf16>
    %c7 = arith.constant 7 : index
    %c0_40 = arith.constant 0 : index
    %c0_41 = arith.constant 0 : index
    %45 = vector.load %arg2[%c7, %c0_40, %c0_41] : memref<9x4x4xbf16, #tpu.memory_space<vmem>>, vector<1x4x4xbf16>
    %46 = vector.shape_cast %45 : vector<1x4x4xbf16> to vector<4x4xbf16>
    %cst_42 = arith.constant dense<0.000000e+00> : vector<4x384xf32>
    %47 = tpu.matmul %46, %44, %cst_42 {dimension_numbers = #tpu.dot_dimension_numbers<[1], [0], [0], [1], [0, 0, 1, 1], [], []>} : vector<4x4xbf16>, vector<4x384xbf16>, vector<4x384xf32> -> vector<4x384xf32>
    %48 = arith.addf %42, %47 : vector<4x384xf32>
    %c0_43 = arith.constant 0 : index
    %c0_44 = arith.constant 0 : index
    %c38 = arith.constant 38 : index
    %49 = vector.load %arg1[%c0_43, %c0_44, %c38] : memref<1x4x512xbf16, #tpu.memory_space<vmem>>, vector<1x4x384xbf16>
    %50 = vector.shape_cast %49 : vector<1x4x384xbf16> to vector<4x384xbf16>
    %c8 = arith.constant 8 : index
    %c0_45 = arith.constant 0 : index
    %c0_46 = arith.constant 0 : index
    %51 = vector.load %arg2[%c8, %c0_45, %c0_46] : memref<9x4x4xbf16, #tpu.memory_space<vmem>>, vector<1x4x4xbf16>
    %52 = vector.shape_cast %51 : vector<1x4x4xbf16> to vector<4x4xbf16>
    %cst_47 = arith.constant dense<0.000000e+00> : vector<4x384xf32>
    %53 = tpu.matmul %52, %50, %cst_47 {dimension_numbers = #tpu.dot_dimension_numbers<[1], [0], [0], [1], [0, 0, 1, 1], [], []>} : vector<4x4xbf16>, vector<4x384xbf16>, vector<4x384xf32> -> vector<4x384xf32>
    %54 = arith.addf %48, %53 : vector<4x384xf32>
    %c0_48 = arith.constant 0 : index
    %c0_49 = arith.constant 0 : index
    %55 = vector.load %arg3[%c0_48, %c0_49] : memref<4x1xf32, #tpu.memory_space<vmem>>, vector<4x1xf32>
    %56 = vector.broadcast %55 : vector<4x1xf32> to vector<4x384xf32>
    %57 = arith.addf %54, %56 : vector<4x384xf32>
    %cst_50 = arith.constant 0.000000e+00 : f32
    %58 = vector.broadcast %cst_50 : f32 to vector<4x384xf32>
    %59 = arith.maximumf %57, %58 : vector<4x384xf32>
    %c0_51 = arith.constant 0 : index
    %c0_52 = arith.constant 0 : index
    %60 = vector.load %arg4[%c0_51, %c0_52] : memref<4x4xbf16, #tpu.memory_space<vmem>>, vector<4x4xbf16>
    %61 = arith.truncf %59 : vector<4x384xf32> to vector<4x384xbf16>
    %cst_53 = arith.constant dense<0.000000e+00> : vector<4x384xf32>
    %62 = tpu.matmul %60, %61, %cst_53 {dimension_numbers = #tpu.dot_dimension_numbers<[1], [0], [0], [1], [0, 0, 1, 1], [], []>} : vector<4x4xbf16>, vector<4x384xbf16>, vector<4x384xf32> -> vector<4x384xf32>
    %c0_54 = arith.constant 0 : index
    %c0_55 = arith.constant 0 : index
    %63 = vector.load %arg5[%c0_54, %c0_55] : memref<4x1xf32, #tpu.memory_space<vmem>>, vector<4x1xf32>
    %64 = vector.broadcast %63 : vector<4x1xf32> to vector<4x384xf32>
    %65 = arith.addf %62, %64 : vector<4x384xf32>
    %c0_56 = arith.constant 0 : index
    %c0_57 = arith.constant 0 : index
    %c0_58 = arith.constant 0 : index
    %66 = vector.load %arg6[%c0_56, %c0_57, %c0_58] : memref<1x4x384xf32, #tpu.memory_space<vmem>>, vector<1x4x384xf32>
    %67 = vector.shape_cast %66 : vector<1x4x384xf32> to vector<4x384xf32>
    %68 = vector.shape_cast %65 : vector<4x384xf32> to vector<1x4x384xf32>
    tpu.vector_store %arg6[%c0_56, %c0_57, %c0_58], %68 {strides = array<i32>} : memref<1x4x384xf32, #tpu.memory_space<vmem>>, vector<1x4x384xf32>,
    %cst_59 = arith.constant dense<0.000000e+00> : vector<384xf32>
    %69 = vector.multi_reduction <add>, %65, %cst_59 [0] : vector<4x384xf32> to vector<384xf32>
    %70 = vector.shape_cast %69 : vector<384xf32> to vector<1x384xf32>
    %cst_60 = arith.constant 4.000000e+00 : f32
    %71 = vector.broadcast %cst_60 : f32 to vector<1x384xf32>
    %72 = arith.divf %70, %71 : vector<1x384xf32>
    %c0_61 = arith.constant 0 : index
    %c0_62 = arith.constant 0 : index
    %c0_63 = arith.constant 0 : index
    %73 = vector.load %arg7[%c0_61, %c0_62, %c0_63] : memref<1x1x384xf32, #tpu.memory_space<vmem>>, vector<1x1x384xf32>
    %74 = vector.shape_cast %73 : vector<1x1x384xf32> to vector<1x384xf32>
    %75 = vector.shape_cast %72 : vector<1x384xf32> to vector<1x1x384xf32>
    tpu.vector_store %arg7[%c0_61, %c0_62, %c0_63], %75 {strides = array<i32>} : memref<1x1x384xf32, #tpu.memory_space<vmem>>, vector<1x1x384xf32>,
    return
  }
  func.func @transform_0(%arg0: i32) -> (i32, i32, i32) {
    %c0_i32 = arith.constant 0 : i32
    %c0_i32_0 = arith.constant 0 : i32
    %c0_i32_1 = arith.constant 0 : i32
    return %arg0, %c0_i32, %c0_i32_0 : i32, i32, i32
  }
  func.func @transform_1(%arg0: i32) -> (i32, i32, i32) {
    %c0_i32 = arith.constant 0 : i32
    %c0_i32_0 = arith.constant 0 : i32
    %c0_i32_1 = arith.constant 0 : i32
    %c0_i32_2 = arith.constant 0 : i32
    return %c0_i32, %c0_i32_0, %c0_i32_1 : i32, i32, i32
  }
  func.func @transform_2(%arg0: i32) -> (i32, i32) {
    %c0_i32 = arith.constant 0 : i32
    %c0_i32_0 = arith.constant 0 : i32
    %c0_i32_1 = arith.constant 0 : i32
    return %c0_i32, %c0_i32_0 : i32, i32
  }
  func.func @transform_3(%arg0: i32) -> (i32, i32) {
    %c0_i32 = arith.constant 0 : i32
    %c0_i32_0 = arith.constant 0 : i32
    %c0_i32_1 = arith.constant 0 : i32
    return %c0_i32, %c0_i32_0 : i32, i32
  }
  func.func @transform_4(%arg0: i32) -> (i32, i32) {
    %c0_i32 = arith.constant 0 : i32
    %c0_i32_0 = arith.constant 0 : i32
    %c0_i32_1 = arith.constant 0 : i32
    return %c0_i32, %c0_i32_0 : i32, i32
  }
  func.func @transform_5(%arg0: i32) -> (i32, i32, i32) {
    %c0_i32 = arith.constant 0 : i32
    %c0_i32_0 = arith.constant 0 : i32
    %c0_i32_1 = arith.constant 0 : i32
    return %arg0, %c0_i32, %c0_i32_0 : i32, i32, i32
  }
  func.func @transform_6(%arg0: i32) -> (i32, i32, i32) {
    %c0_i32 = arith.constant 0 : i32
    %c0_i32_0 = arith.constant 0 : i32
    %c0_i32_1 = arith.constant 0 : i32
    return %arg0, %c0_i32, %c0_i32_0 : i32, i32, i32
  }
}

module attributes {stable_mosaic.version = 11 : i64} {
  func.func @_dht_fwd_kernel(%arg0: i32, %arg1: i32, %arg2: memref<2x256xbf16, #tpu.memory_space<vmem>>, %arg3: memref<256x128xbf16, #tpu.memory_space<vmem>>, %arg4: memref<2x128xf32, #tpu.memory_space<vmem>>, %arg5: memref<2x128xf32, #tpu.memory_space<vmem>>) attributes {dimension_semantics = [#tpu.dimension_semantics<parallel>, #tpu.dimension_semantics<arbitrary>], iteration_bounds = array<i64: 1, 1>, scalar_prefetch = 0 : i64, scratch_operands = 1 : i64, tpu.core_type = #tpu.core_type<tc>, window_params = [{transform_indices = @transform_0, window_bounds = array<i64: 2, 256>}, {transform_indices = @transform_1, window_bounds = array<i64: 256, 128>}, {transform_indices = @transform_2, window_bounds = array<i64: 2, 128>}]} {
    %c0_i32 = arith.constant 0 : i32
    %0 = arith.cmpi eq, %arg1, %c0_i32 : i32
    %1 = arith.extui %0 : i1 to i32
    %c0_i32_0 = arith.constant 0 : i32
    %2 = arith.cmpi ne, %1, %c0_i32_0 : i32
    scf.if %2 {
      %cst_10 = arith.constant 0.000000e+00 : f32
      %12 = vector.broadcast %cst_10 : f32 to vector<2x128xf32>
      %c0_11 = arith.constant 0 : index
      %c0_12 = arith.constant 0 : index
      %13 = vector.load %arg5[%c0_11, %c0_12] : memref<2x128xf32, #tpu.memory_space<vmem>>, vector<2x128xf32>
      tpu.vector_store %arg5[%c0_11, %c0_12], %12 {strides = array<i32>} : memref<2x128xf32, #tpu.memory_space<vmem>>, vector<2x128xf32>,
    } else {
    }
    %c0 = arith.constant 0 : index
    %c0_1 = arith.constant 0 : index
    %3 = vector.load %arg5[%c0, %c0_1] : memref<2x128xf32, #tpu.memory_space<vmem>>, vector<2x128xf32>
    %c0_2 = arith.constant 0 : index
    %c0_3 = arith.constant 0 : index
    %4 = vector.load %arg2[%c0_2, %c0_3] : memref<2x256xbf16, #tpu.memory_space<vmem>>, vector<2x256xbf16>
    %c0_4 = arith.constant 0 : index
    %c0_5 = arith.constant 0 : index
    %5 = vector.load %arg3[%c0_4, %c0_5] : memref<256x128xbf16, #tpu.memory_space<vmem>>, vector<256x128xbf16>
    %cst = arith.constant dense<0.000000e+00> : vector<2x128xf32>
    %6 = tpu.matmul %4, %5, %cst {dimension_numbers = #tpu.dot_dimension_numbers<[1], [0], [0], [1], [0, 0, 1, 1], [], []>} : vector<2x256xbf16>, vector<256x128xbf16>, vector<2x128xf32> -> vector<2x128xf32>
    %7 = arith.addf %3, %6 : vector<2x128xf32>
    %c0_6 = arith.constant 0 : index
    %c0_7 = arith.constant 0 : index
    %8 = vector.load %arg5[%c0_6, %c0_7] : memref<2x128xf32, #tpu.memory_space<vmem>>, vector<2x128xf32>
    tpu.vector_store %arg5[%c0_6, %c0_7], %7 {strides = array<i32>} : memref<2x128xf32, #tpu.memory_space<vmem>>, vector<2x128xf32>,
    %c0_i32_8 = arith.constant 0 : i32
    %9 = arith.cmpi eq, %arg1, %c0_i32_8 : i32
    %10 = arith.extui %9 : i1 to i32
    %c0_i32_9 = arith.constant 0 : i32
    %11 = arith.cmpi ne, %10, %c0_i32_9 : i32
    scf.if %11 {
      %c0_10 = arith.constant 0 : index
      %c0_11 = arith.constant 0 : index
      %12 = vector.load %arg5[%c0_10, %c0_11] : memref<2x128xf32, #tpu.memory_space<vmem>>, vector<2x128xf32>
      %c0_12 = arith.constant 0 : index
      %c0_13 = arith.constant 0 : index
      %13 = vector.load %arg4[%c0_12, %c0_13] : memref<2x128xf32, #tpu.memory_space<vmem>>, vector<2x128xf32>
      tpu.vector_store %arg4[%c0_12, %c0_13], %12 {strides = array<i32>} : memref<2x128xf32, #tpu.memory_space<vmem>>, vector<2x128xf32>,
    } else {
    }
    return
  }
  func.func @transform_0(%arg0: i32, %arg1: i32) -> (i32, i32) {
    %c0_i32 = arith.constant 0 : i32
    %c0_i32_0 = arith.constant 0 : i32
    return %c0_i32, %arg1 : i32, i32
  }
  func.func @transform_1(%arg0: i32, %arg1: i32) -> (i32, i32) {
    %c0_i32 = arith.constant 0 : i32
    return %arg1, %arg0 : i32, i32
  }
  func.func @transform_2(%arg0: i32, %arg1: i32) -> (i32, i32) {
    %c0_i32 = arith.constant 0 : i32
    %c0_i32_0 = arith.constant 0 : i32
    return %c0_i32, %arg0 : i32, i32
  }
}

module attributes {stable_mosaic.version = 11 : i64} {
  func.func @_mask_bp_kernel(%arg0: i32, %arg1: i32, %arg2: memref<2x128xbf16, #tpu.memory_space<vmem>>, %arg3: memref<256x128xbf16, #tpu.memory_space<vmem>>, %arg4: memref<2x256xf32, #tpu.memory_space<vmem>>, %arg5: memref<2x256xf32, #tpu.memory_space<vmem>>) attributes {dimension_semantics = [#tpu.dimension_semantics<parallel>, #tpu.dimension_semantics<arbitrary>], iteration_bounds = array<i64: 1, 1>, scalar_prefetch = 0 : i64, scratch_operands = 1 : i64, tpu.core_type = #tpu.core_type<tc>, window_params = [{transform_indices = @transform_0, window_bounds = array<i64: 2, 128>}, {transform_indices = @transform_1, window_bounds = array<i64: 256, 128>}, {transform_indices = @transform_2, window_bounds = array<i64: 2, 256>}]} {
    %c0_i32 = arith.constant 0 : i32
    %0 = arith.cmpi eq, %arg1, %c0_i32 : i32
    %1 = arith.extui %0 : i1 to i32
    %c0_i32_0 = arith.constant 0 : i32
    %2 = arith.cmpi ne, %1, %c0_i32_0 : i32
    scf.if %2 {
      %cst_10 = arith.constant 0.000000e+00 : f32
      %12 = vector.broadcast %cst_10 : f32 to vector<2x256xf32>
      %c0_11 = arith.constant 0 : index
      %c0_12 = arith.constant 0 : index
      %13 = vector.load %arg5[%c0_11, %c0_12] : memref<2x256xf32, #tpu.memory_space<vmem>>, vector<2x256xf32>
      tpu.vector_store %arg5[%c0_11, %c0_12], %12 {strides = array<i32>} : memref<2x256xf32, #tpu.memory_space<vmem>>, vector<2x256xf32>,
    } else {
    }
    %c0 = arith.constant 0 : index
    %c0_1 = arith.constant 0 : index
    %3 = vector.load %arg5[%c0, %c0_1] : memref<2x256xf32, #tpu.memory_space<vmem>>, vector<2x256xf32>
    %c0_2 = arith.constant 0 : index
    %c0_3 = arith.constant 0 : index
    %4 = vector.load %arg2[%c0_2, %c0_3] : memref<2x128xbf16, #tpu.memory_space<vmem>>, vector<2x128xbf16>
    %c0_4 = arith.constant 0 : index
    %c0_5 = arith.constant 0 : index
    %5 = vector.load %arg3[%c0_4, %c0_5] : memref<256x128xbf16, #tpu.memory_space<vmem>>, vector<256x128xbf16>
    %cst = arith.constant dense<0.000000e+00> : vector<2x256xf32>
    %6 = tpu.matmul %4, %5, %cst {dimension_numbers = #tpu.dot_dimension_numbers<[1], [1], [0], [0], [0, 0, 1, 0], [], []>} : vector<2x128xbf16>, vector<256x128xbf16>, vector<2x256xf32> -> vector<2x256xf32>
    %7 = arith.addf %3, %6 : vector<2x256xf32>
    %c0_6 = arith.constant 0 : index
    %c0_7 = arith.constant 0 : index
    %8 = vector.load %arg5[%c0_6, %c0_7] : memref<2x256xf32, #tpu.memory_space<vmem>>, vector<2x256xf32>
    tpu.vector_store %arg5[%c0_6, %c0_7], %7 {strides = array<i32>} : memref<2x256xf32, #tpu.memory_space<vmem>>, vector<2x256xf32>,
    %c0_i32_8 = arith.constant 0 : i32
    %9 = arith.cmpi eq, %arg1, %c0_i32_8 : i32
    %10 = arith.extui %9 : i1 to i32
    %c0_i32_9 = arith.constant 0 : i32
    %11 = arith.cmpi ne, %10, %c0_i32_9 : i32
    scf.if %11 {
      %c0_10 = arith.constant 0 : index
      %c0_11 = arith.constant 0 : index
      %12 = vector.load %arg5[%c0_10, %c0_11] : memref<2x256xf32, #tpu.memory_space<vmem>>, vector<2x256xf32>
      %cst_12 = arith.constant 1.250000e-01 : f32
      %13 = vector.broadcast %cst_12 : f32 to vector<2x256xf32>
      %14 = arith.mulf %12, %13 : vector<2x256xf32>
      %15 = arith.negf %14 : vector<2x256xf32>
      %16 = math.exp %15 : vector<2x256xf32>
      %cst_13 = arith.constant 1.000000e+00 : f32
      %17 = vector.broadcast %cst_13 : f32 to vector<2x256xf32>
      %18 = arith.addf %17, %16 : vector<2x256xf32>
      %19 = arith.divf %17, %18 : vector<2x256xf32>
      %c0_14 = arith.constant 0 : index
      %c0_15 = arith.constant 0 : index
      %20 = vector.load %arg4[%c0_14, %c0_15] : memref<2x256xf32, #tpu.memory_space<vmem>>, vector<2x256xf32>
      tpu.vector_store %arg4[%c0_14, %c0_15], %19 {strides = array<i32>} : memref<2x256xf32, #tpu.memory_space<vmem>>, vector<2x256xf32>,
    } else {
    }
    return
  }
  func.func @transform_0(%arg0: i32, %arg1: i32) -> (i32, i32) {
    %c0_i32 = arith.constant 0 : i32
    %c0_i32_0 = arith.constant 0 : i32
    return %c0_i32, %arg1 : i32, i32
  }
  func.func @transform_1(%arg0: i32, %arg1: i32) -> (i32, i32) {
    %c0_i32 = arith.constant 0 : i32
    return %arg0, %arg1 : i32, i32
  }
  func.func @transform_2(%arg0: i32, %arg1: i32) -> (i32, i32) {
    %c0_i32 = arith.constant 0 : i32
    %c0_i32_0 = arith.constant 0 : i32
    return %c0_i32, %arg0 : i32, i32
  }
}

</mosaic_0001>

<bundles_post_ra>
// kernel: squeeze.0
= control target key start
LH: loop header
LB: loop body
LE: loop exit
PB: predicated region body
PF: predicated region fallthrough
CT: control target
= control target key end

     0   :  { %s233_s12 = smov 114   ;;  %vm142_vm0 = vcmask 1014784   ;;  %s234_s13 = smov 92   ;;  %vm51_vm1 = vcmask 146432   ;;  %vm155_vm2 = vcmask 1031168   ;;  %vm146_vm3 = vcmask 31744   ;;  %s286_s0 = inlined_call_operand.vmem [shape: bf16[2,288], index: 0, kind: input, shape index: {}]   ;;  %s287_s1 = inlined_call_operand.vmem [shape: bf16[2,16,18], index: 1, kind: output, shape index: {}]  }
   0x1   :  { %v46_v0 = vld [vmem:[%s286_s0] sm:$0x1]  ;;  %v201_v1 = vld [vmem:[%s286_s0 + $0x2] sm:$0x1]  ;;  %v202_v4 = vld [vmem:[%s286_s0 + $0x1] sm:$0x1] }
   0x2   :  { %v47_v2 = vunpack.c.l.bf16 %v46_v0  ;;  %v18_v3 = vunpack.c.l.bf16 %v201_v1  ;;  %v33_v5 = vunpack.c.l.bf16 %v202_v4  ;;  %s232_s0 = smov 110   ;;  %s235_s14 = smov 112   ;;  %vm149_vm4 = vcmask 146464  }
   0x3   :  { %s236_s15 = smov 4   ;;  %s237_s16 = smov 94   ;;  %vm159_vm5 = vcmask 15360   ;;  %vm162_vm6 = vcmask 146448  }
   0x4   :  { %49 = vst [vmem:[#allocation1 + $0x8] sm:$0x3] %v47_v2  ;;  %21 = vst [vmem:[#allocation1] sm:$0x3] %v18_v3  ;;  %s238_s17 = smov 2   ;;  %s239_s18 = smov 76  }
   0x5   :  { %36 = vst [vmem:[#allocation1 + $0x10] sm:$0x3] %v33_v5  ;;  %s240_s19 = smov 74   ;;  %s241_s20 = smov 58  }
   0x6   :  { %s242_s21 = smov 56   ;;  %s243_s22 = smov 40  }
   0x7   :  { %s244_s23 = smov 38   ;;  %s245_s24 = smov 22  }
   0x8   :  { %s246_s25 = smov 20  }
   0xb   :  { %v67_v6 = vld [vmem:[#allocation1 + $0x8] sm:$0x3]   ;;  %v54_v7 = vld [vmem:[#allocation1] sm:$0x3]  }
   0xc   :  { %68 = vrot.lane.b32.xlu0 %v67_v6, %s232_s0  ;;  %55 = vrot.lane.b32.xlu1 %v54_v7, %s233_s12  ;;  %v80_v8 = vld [vmem:[#allocation1 + $0x8] sm:$0x3]   ;;  %v61_v9 = vld [vmem:[#allocation1 + $0x10] sm:$0x3]   ;;  %v141_v11 = vld [vmem:[#allocation1] sm:$0x3]  }
   0xd   :  { %v139_v10 = vld [vmem:[#allocation1 + $0x10] sm:$0x3]   ;;  %v50_v12 = vld [vmem:[#allocation1 + $0x8] sm:$0x3]  }
   0xe   :  { %v143_v13 = vsel %vm142_vm0, %v141_v11, %v139_v10  ;;  %v74_v14 = vld [vmem:[#allocation1 + $0x10] sm:$0x3]   ;;  %52 = vst.msk [vmem:[#allocation0] ss:$16 sm:$0x3] %vm51_vm1, %v50_v12  }
   0xf   :  { %v152_v15 = vld [vmem:[#allocation1 + $0x8] sm:$0x3]   ;;  %v154_v16 = vld [vmem:[#allocation1 + $0x10] sm:$0x3]  }
  0x10   :  { %81 = vrot.lane.b32.xlu0 %v80_v8, %s234_s13  ;;  %62 = vrot.lane.b32.xlu1 %v61_v9, %s235_s14  ;;  %v156_v17 = vsel %vm155_vm2, %v154_v16, %v152_v15  ;;  %v87_v18 = vld [vmem:[#allocation1 + $0x10] sm:$0x3]   ;;  %v93_v19 = vld [vmem:[#allocation1 + $0x8] sm:$0x3]  }
  0x11   :  { %v100_v20 = vld [vmem:[#allocation1 + $0x10] sm:$0x3]   ;;  %v106_v21 = vld [vmem:[#allocation1 + $0x8] sm:$0x3]  }
  0x12   :  { %v113_v22 = vld [vmem:[#allocation1 + $0x10] sm:$0x3]   ;;  %v119_v23 = vld [vmem:[#allocation1 + $0x8] sm:$0x3]  }
  0x13   :  { %v126_v24 = vld [vmem:[#allocation1 + $0x10] sm:$0x3]   ;;  %v132_v25 = vld [vmem:[#allocation1 + $0x8] sm:$0x3]  }
  0x14   :  { %144 = vrot.lane.b32.xlu0 %v143_v13, %s236_s15  ;;  %75 = vrot.lane.b32.xlu1 %v74_v14, %s237_s16 }
  0x18   :  { %157 = vrot.lane.b32.xlu0 %v156_v17, %s238_s17  ;;  %88 = vrot.lane.b32.xlu1 %v87_v18, %s239_s18 }
  0x1c   :  { %94 = vrot.lane.b32.xlu0 %v93_v19, %s240_s19  ;;  %101 = vrot.lane.b32.xlu1 %v100_v20, %s241_s20 }
  0x20   :  { %107 = vrot.lane.b32.xlu0 %v106_v21, %s242_s21  ;;  %114 = vrot.lane.b32.xlu1 %v113_v22, %s243_s22 }
  0x24   :  { %120 = vrot.lane.b32.xlu0 %v119_v23, %s244_s23  ;;  %127 = vrot.lane.b32.xlu1 %v126_v24, %s245_s24 }
  0x28   :  { %133 = vrot.lane.b32.xlu0 %v132_v25, %s246_s25 }
  0x7e   :  { %v69_v26 = vpop.permute.xlu0 %68   ;;  %v56_v27 = vpop.permute.xlu1 %55  }
  0x7f   :  { %72 = vst.msk [vmem:[#allocation0 + $0x1] ss:$16 sm:$0x3] %vm51_vm1, %v69_v26   ;;  %59 = vst.msk [vmem:[#allocation0 + $0xf] ss:$16 sm:$0x3] %vm51_vm1, %v56_v27  }
  0x82   :  { %v82_v28 = vpop.permute.xlu0 %81   ;;  %v63_v29 = vpop.permute.xlu1 %62  }
  0x83   :  { %85 = vst.msk [vmem:[#allocation0 + $0x2] ss:$16 sm:$0x3] %vm51_vm1, %v82_v28   ;;  %66 = vst.msk [vmem:[#allocation0 + $0x8] ss:$16 sm:$0x3] %vm51_vm1, %v63_v29  }
  0x86   :  { %v145_v30 = vpop.permute.xlu0 %144   ;;  %v76_v31 = vpop.permute.xlu1 %75  }
  0x87   :  { %148 = vst.msk [vmem:[#allocation0 + $0xe] ss:$16 sm:$0x3] %vm146_vm3, %v145_v30  }
  0x88   :  { %79 = vst.msk [vmem:[#allocation0 + $0x9] ss:$16 sm:$0x3] %vm51_vm1, %v76_v31  }
  0x89   :  { %151 = vst.msk [vmem:[#allocation0 + $0xe] ss:$16 sm:$0x3] %vm149_vm4, %v145_v30  }
  0x8a   :  { %v158_v32 = vpop.permute.xlu0 %157   ;;  %v89_v33 = vpop.permute.xlu1 %88  }
  0x8b   :  { %161 = vst.msk [vmem:[#allocation0 + $0x7] ss:$16 sm:$0x3] %vm159_vm5, %v158_v32  }
  0x8c   :  { %92 = vst.msk [vmem:[#allocation0 + $0xa] ss:$16 sm:$0x3] %vm51_vm1, %v89_v33  }
  0x8d   :  { %164 = vst.msk [vmem:[#allocation0 + $0x7] ss:$16 sm:$0x3] %vm162_vm6, %v158_v32  }
  0x8e   :  { %v95_v34 = vpop.permute.xlu0 %94   ;;  %v102_v35 = vpop.permute.xlu1 %101  }
  0x8f   :  { %98 = vst.msk [vmem:[#allocation0 + $0x3] ss:$16 sm:$0x3] %vm51_vm1, %v95_v34   ;;  %105 = vst.msk [vmem:[#allocation0 + $0xb] ss:$16 sm:$0x3] %vm51_vm1, %v102_v35  }
  0x92   :  { %v108_v36 = vpop.permute.xlu0 %107   ;;  %v115_v37 = vpop.permute.xlu1 %114  }
  0x93   :  { %111 = vst.msk [vmem:[#allocation0 + $0x4] ss:$16 sm:$0x3] %vm51_vm1, %v108_v36   ;;  %118 = vst.msk [vmem:[#allocation0 + $0xc] ss:$16 sm:$0x3] %vm51_vm1, %v115_v37  }
  0x96   :  { %v121_v38 = vpop.permute.xlu0 %120   ;;  %v128_v39 = vpop.permute.xlu1 %127  }
  0x97   :  { %124 = vst.msk [vmem:[#allocation0 + $0x5] ss:$16 sm:$0x3] %vm51_vm1, %v121_v38   ;;  %131 = vst.msk [vmem:[#allocation0 + $0xd] ss:$16 sm:$0x3] %vm51_vm1, %v128_v39  }
  0x9a   :  { %v134_v40 = vpop.permute.xlu0 %133  }
  0x9b   :  { %137 = vst.msk [vmem:[#allocation0 + $0x6] ss:$16 sm:$0x3] %vm51_vm1, %v134_v40  }
  0x9e   :  { %v176_v41 = vld [vmem:[#allocation0 + $0x8] sm:$0xff]  ;;  %v191_v42 = vld [vmem:[#allocation0 + $0x18] sm:$0xff] }
  0xa2   :  { %v170_v43 = vld [vmem:[#allocation0] sm:$0xff]  ;;  %v183_v44 = vld [vmem:[#allocation0 + $0x10] sm:$0xff] }
  0xa3   :  { %v209_v45 = vpack.c.bf16 %v176_v41, %v170_v43  ;;  %v214_v46 = vpack.c.bf16 %v191_v42, %v183_v44 }
  0xa5   :  { %210 = vst [vmem:[%s287_s1] sm:$0xff] %v209_v45   ;;  %216 = vst [vmem:[%s287_s1 + $0x8] sm:$0xff] %v214_v46  }

// kernel: ht_mask_forward.4
= control target key start
LH: loop header
LB: loop body
LE: loop exit
PB: predicated region body
PF: predicated region fallthrough
CT: control target
= control target key end

     0   :  { %v280_v6 = vmov 1966171168   ;;  %v63_v8 = vlaneseq  ;;  %v281_v26 = vmov 0.0   ;;  %s351_s1 = inlined_call_operand.vmem [shape: bf16[256,128], index: 1, kind: input, shape index: {}]   ;;  %s352_s0 = inlined_call_operand.vmem [shape: bf16[2,256], index: 0, kind: input, shape index: {}]   ;;  %s353_s2 = inlined_call_operand.vmem [shape: f32[2,128], index: 2, kind: output, shape index: {}]  }
   0x1   :  { %v264_v0 = vld [vmem:[%s351_s1 + $0x78] sm:$0xff]   ;;  %v266_v2 = vld [vmem:[%s351_s1 + $0x70] sm:$0xff]   ;;  %v268_v4 = vld [vmem:[%s351_s1 + $0x68] sm:$0xff]   ;;  %v61_v7 = vunpack.c.l.s4 %v280_v6  ;;  %16 = vst [vmem:[#allocation2] sm:$0x3] %v281_v26 }
   0x2   :  { %v265_v1 = vld [vmem:[%s351_s1 + $0x38] sm:$0xff]   ;;  %240 = vmatprep.subr.bf16.mxu0 %v264_v0  ;;  %v267_v3 = vld [vmem:[%s351_s1 + $0x30] sm:$0xff]   ;;  %v269_v5 = vld [vmem:[%s351_s1 + $0x28] sm:$0xff]   ;;  %v64_v12 = vshrl.u32 %v63_v8, 7 }
   0x3   :  { %241 = vmatpush3.bf16.msra.mxu0 %v265_v1  ;;  %v270_v9 = vld [vmem:[%s351_s1 + $0x60] sm:$0xff]   ;;  %v62_v11 = vunpack.c.0.s8 %v61_v7  ;;  %v272_v13 = vld [vmem:[%s351_s1 + $0x58] sm:$0xff]   ;;  %v274_v16 = vld [vmem:[%s351_s1 + $0x50] sm:$0xff]  }
   0x4   :  { %242 = vmatprep.subr.bf16.mxu0 %v266_v2  ;;  %v271_v10 = vld [vmem:[%s351_s1 + $0x20] sm:$0xff]   ;;  %v273_v14 = vld [vmem:[%s351_s1 + $0x18] sm:$0xff]   ;;  %v275_v19 = vld [vmem:[%s351_s1 + $0x10] sm:$0xff]  }
   0x5   :  { %v65_v15 = vsub.s32 %v62_v11, %v64_v12  ;;  %v223_v17 = vld.sshfl [vmem:[%s352_s0] sm:$0x11 pattern:$0x75316420]  ;;  %v276_v21 = vld [vmem:[%s351_s1 + $0x48] sm:$0xff]  }
   0x6   :  { %v59_v18 = vcombine.high %v223_v17, %v223_v17  ;;  %v277_v22 = vld [vmem:[%s351_s1 + $0x8] sm:$0xff]   ;;  %v278_v23 = vld [vmem:[%s351_s1 + $0x40] sm:$0xff]  }
   0x7   :  { %243 = vmatpush3.bf16.msra.mxu0 %v267_v3  ;;  %v279_v24 = vld [vmem:[%s351_s1] sm:$0xff]   ;;  %v66_v25 = vrot.slane %v223_v17, %v65_v15 }
   0x8   :  { %244 = vmatprep.subr.bf16.mxu0 %v268_v4  ;;  %v73_v20 = vrot.slane %v59_v18, %v65_v15  ;;  %v17_v28 = vld [vmem:[#allocation2] sm:$0x3] }
   0xa   :  { %204 = vmatprep.mubr.bf16.mxu0 %v73_v20 }
   0xb   :  { %245 = vmatpush3.bf16.msra.mxu0 %v269_v5 }
   0xc   :  { %246 = vmatprep.subr.bf16.mxu0 %v270_v9 }
   0xf   :  { %247 = vmatpush3.bf16.msra.mxu0 %v271_v10 }
  0x10   :  { %248 = vmatprep.subr.bf16.mxu0 %v272_v13 }
  0x13   :  { %249 = vmatpush3.bf16.msra.mxu0 %v273_v14 }
  0x14   :  { %250 = vmatprep.subr.bf16.mxu0 %v274_v16 }
  0x17   :  { %251 = vmatpush3.bf16.msra.mxu0 %v275_v19 }
  0x18   :  { %252 = vmatprep.subr.bf16.mxu0 %v276_v21 }
  0x1b   :  { %253 = vmatpush3.bf16.msra.mxu0 %v277_v22 }
  0x1c   :  { %254 = vmatprep.subr.bf16.mxu0 %v278_v23 }
  0x1f   :  { %255 = vmatpush3.bf16.msra.mxu0 %v279_v24 }
  0x22   :  { %205 = vmatmul.mubr.bf16.vlgmr.msra.gmra.mxu0 %v66_v25 }
  0xe2   :  { %v256_v27 = vpop.f32.mrf.mxu0 }
  0xe4   :  { %v257_v29 = vpop.f32.mrf.mxu0 }
  0xe5   :  { %v258_v30 = vadd.f32 %v257_v29, %v256_v27 }
  0xe6   :  { %v259_v31 = vpop.f32.mrf.mxu0 }
  0xe7   :  { %v212_v32 = vadd.f32 %v258_v30, %v17_v28 }
  0xe8   :  { %v260_v33 = vpop.f32.mrf.mxu0 }
  0xe9   :  { %213 = vst [vmem:[#allocation2] sm:$0x3] %v212_v32 }
  0xf0   :  { %v217_v34 = vld [vmem:[#allocation2] sm:$0x3] }
  0xf1   :  { %218 = vst [vmem:[%s353_s2] sm:$0x3] %v217_v34 }

// kernel: ht_mask_forward.5
= control target key start
LH: loop header
LB: loop body
LE: loop exit
PB: predicated region body
PF: predicated region fallthrough
CT: control target
= control target key end

     0   :  { %v274_v17 = vmov 0.0   ;;  %v275_v18 = vmov 1983009808   ;;  %v194_v20 = vlaneseq  ;;  %s345_s1 = inlined_call_operand.vmem [shape: bf16[256,128], index: 1, kind: input, shape index: {}]   ;;  %s346_s0 = inlined_call_operand.vmem [shape: bf16[2,128], index: 0, kind: input, shape index: {}]   ;;  %s347_s2 = inlined_call_operand.vmem [shape: f32[2,256], index: 2, kind: output, shape index: {}]  }
   0x1   :  { %v254_v0 = vld [vmem:[%s345_s1 + $0x78] sm:$0xff]   ;;  %v256_v2 = vld [vmem:[%s345_s1 + $0x70] sm:$0xff]   ;;  %v258_v4 = vld [vmem:[%s345_s1 + $0x68] sm:$0xff]   ;;  %16 = vst [vmem:[#allocation2] sm:$0xf] %v274_v17  ;;  %v192_v19 = vunpack.c.l.s4 %v275_v18 }
   0x2   :  { %v255_v1 = vld [vmem:[%s345_s1 + $0x38] sm:$0xff]   ;;  %234 = vmatprep.subr.bf16.mxu0 %v254_v0  ;;  %v257_v3 = vld [vmem:[%s345_s1 + $0x30] sm:$0xff]   ;;  %v259_v5 = vld [vmem:[%s345_s1 + $0x28] sm:$0xff]   ;;  %v195_v22 = vshrl.u32 %v194_v20, 7 }
   0x3   :  { %235 = vmatpush3.bf16.xpose.msra.mxu0 %v255_v1  ;;  %v260_v6 = vld [vmem:[%s345_s1 + $0x60] sm:$0xff]   ;;  %v262_v9 = vld [vmem:[%s345_s1 + $0x58] sm:$0xff]   ;;  %v264_v11 = vld [vmem:[%s345_s1 + $0x50] sm:$0xff]   ;;  %v193_v21 = vunpack.c.0.s8 %v192_v19 }
   0x4   :  { %236 = vmatprep.subr.bf16.mxu0 %v256_v2  ;;  %v18_v7 = vld [vmem:[%s346_s0] sm:$0x1]  ;;  %v263_v10 = vld [vmem:[%s345_s1 + $0x18] sm:$0xff]   ;;  %v265_v12 = vld [vmem:[%s345_s1 + $0x10] sm:$0xff]  }
   0x5   :  { %250 = vmatprep.mubr.bf16.mxu0 %v18_v7  ;;  %v261_v8 = vld [vmem:[%s345_s1 + $0x20] sm:$0xff]   ;;  %v266_v13 = vld [vmem:[%s345_s1 + $0x48] sm:$0xff]   ;;  %v196_v24 = vsub.s32 %v193_v21, %v195_v22 }
   0x6   :  { %v267_v14 = vld [vmem:[%s345_s1 + $0x8] sm:$0xff]   ;;  %v268_v15 = vld [vmem:[%s345_s1 + $0x40] sm:$0xff]  }
   0x7   :  { %v269_v16 = vld [vmem:[%s345_s1] sm:$0xff]  }
   0x8   :  { %v17_v27 = vld [vmem:[#allocation2] sm:$0xf] }
   0xb   :  { %237 = vmatpush3.bf16.xpose.msra.mxu0 %v257_v3 }
   0xc   :  { %238 = vmatprep.subr.bf16.mxu0 %v258_v4 }
  0x13   :  { %239 = vmatpush3.bf16.xpose.msra.mxu0 %v259_v5 }
  0x14   :  { %240 = vmatprep.subr.bf16.mxu0 %v260_v6 }
  0x1b   :  { %241 = vmatpush3.bf16.xpose.msra.mxu0 %v261_v8 }
  0x1c   :  { %242 = vmatprep.subr.bf16.mxu0 %v262_v9 }
  0x23   :  { %243 = vmatpush3.bf16.xpose.msra.mxu0 %v263_v10 }
  0x24   :  { %244 = vmatprep.subr.bf16.mxu0 %v264_v11 }
  0x2b   :  { %245 = vmatpush3.bf16.xpose.msra.mxu0 %v265_v12 }
  0x2c   :  { %246 = vmatprep.subr.bf16.mxu0 %v266_v13 }
  0x33   :  { %247 = vmatpush3.bf16.xpose.msra.mxu0 %v267_v14 }
  0x34   :  { %248 = vmatprep.subr.bf16.mxu0 %v268_v15 }
  0x3b   :  { %249 = vmatpush3.bf16.xpose.msra.mxu0 %v269_v16 }
  0x42   :  { %251 = vmatmul.mubr.bf16.vlgmr.msra.gmra.mxu0 %v18_v7 }
 0x102   :  { %v181_v23 = vpop.f32.mrf.mxu0 }
 0x104   :  { %v183_v25 = vpop.f32.mrf.mxu0 }
 0x105   :  { %v190_v26 = vcombine.low %v181_v23, %v183_v25 }
 0x106   :  { %v185_v28 = vpop.f32.mrf.mxu0 }
 0x107   :  { %v197_v29 = vrot.slane %v190_v26, %v196_v24 }
 0x108   :  { %v186_v30 = vpop.f32.mrf.mxu0 }
 0x109   :  { %v199_v31 = vadd.f32 %v197_v29, %v17_v27 }
 0x10b   :  { %200 = vst [vmem:[#allocation2] sm:$0xf] %v199_v31 }
 0x112   :  { %v204_v32 = vld [vmem:[#allocation2] sm:$0xf] }
 0x113   :  { %v233_v33 = vmul.f32 -0.125, %v204_v32 }
 0x115   :  { %v207_v34 = vmul.f32 1.442695, %v233_v33 }
 0x117   :  { %270 = vpow2.f32 %v207_v34 }
 0x124   :  { %v271_v35 = vpop.eup %270 }
 0x125   :  { %v209_v36 = vadd.f32 1.0, %v271_v35 }
 0x127   :  { %272 = vrcp.f32 %v209_v36 }
 0x134   :  { %v273_v37 = vpop.eup %272 }
 0x135   :  { %212 = vst [vmem:[%s347_s2] sm:$0xf] %v273_v37 }

// kernel: ht_mask_forward.3
= control target key start
LH: loop header
LB: loop body
LE: loop exit
PB: predicated region body
PF: predicated region fallthrough
CT: control target
= control target key end

     0   :  { %s1884_s21 = smov 0   ;;  %s2054_s0 = inlined_call_operand.vmem [shape: bf16[2,4,512], index: 0, kind: input, shape index: {}]   ;;  %s2055_s1 = inlined_call_operand.vmem [shape: bf16[9,4,4], index: 1, kind: input, shape index: {}]   ;;  %s2056_s2 = inlined_call_operand.vmem [shape: f32[4,1], index: 2, kind: input, shape index: {}]   ;;  %s2057_s3 = inlined_call_operand.vmem [shape: bf16[4,4], index: 3, kind: input, shape index: {}]   ;;  %s2058_s4 = inlined_call_operand.vmem [shape: f32[4,1], index: 4, kind: input, shape index: {}]   ;;  %s2059_s5 = inlined_call_operand.vmem [shape: f32[2,4,384], index: 5, kind: output, shape index: {0}]   ;;  %s2060_s6 = inlined_call_operand.vmem [shape: f32[2,1,384], index: 6, kind: output, shape index: {1}]  }
   0x1 LB: > { %s1672_s22 = sadd.s32 4294967295, %s1834_s21   ;;  %p1676_p0 = scmp.ge.s32.totalorder %s1834_s21, 1  ;;  %s1834_s21 = sphi %s1884_s21, %s17_s21  }
   0x2   : > { %p215_p1 = scmp.lt.s32.totalorder %s1834_s21, 3 }
   0x4   : > { %p216_p2 = pnand %p1676_p0, %p215_p1 }
   0x5   : > { %p249_p3 = scmp.lt.s32.totalorder (!%p216_p2), %s1672_s22, 1  ;;  %s1840_s27 = smov (!%p216_p2), 127  }
   0x6   : > { %219 = sbr.rel (%p216_p2) target bundleno = 636 (0x27c), region = 40  ;;  %s1841_s28 = smov (!%p216_p2), 126  }
   0x7   : > { %s1842_s29 = smov (!%p216_p2), 110   ;;  %s1843_s30 = smov (!%p216_p2), 109  }
   0x8   : > { %s1844_s7 = smov (!%p216_p2), 108   ;;  %s1845_s8 = smov (!%p216_p2), 92  }
   0x9   : > { %s1846_s9 = smov (!%p216_p2), 91   ;;  %s1847_s10 = smov (!%p216_p2), 90  }
   0xb   : > { %v274_v0 = vlaneseq  ;;  %v1836_v1 = vmov 1983009808   ;;  %s2062_s22 = smov (!%p249_p3, %s1672_s22), 1  ;;  %v1837_v5 = vmov 0.0   ;;  %v1838_v6 = vmov 0  }
   0xc   : > { %v272_v2 = vunpack.c.l.s4 %v1836_v1  ;;  %1741 = vmatprep.subr.bf16.mxu1 %v1837_v5  ;;  %345 = vmatprep.mubr.bf16.mxu0 %v1838_v6  ;;  %s1720_s23 = sshll.u32 %s2062_s22, 3  ;;  %vm1839_vm0 = vmmov 0   ;;  %v1407_v18 = vld [vmem:[%s2056_s2] sm:$0xf]  ;;  %vm295_vm1 = vcmask 1039360   ;;  %vm303_vm2 = vcmask 1041408  }
   0xd   : > { %v1895_v3 = vshrl.u32 %v274_v0, 7  ;;  %1824 = vset.pattern.permute.xlu0 %v1838_v6  ;;  %1825 = vset.pattern.permute.xlu1 %v1838_v6  ;;  %s253_s26 = scalar_lea.vmem %s2054_s0, %s1720_s23  ;;  %v1680_v28 = vld [vmem:[%s2055_s1 + $0x2] sm:$0x3]  ;;  %vm299_vm3 = vcmask 31744   ;;  %vm533_vm4 = vcmask 1031168   ;;  %vm662_vm5 = vcmask 900096  }
   0xe   : > { %v273_v4 = vunpack.c.0.s8 %v272_v2  ;;  %v266_v8 = vld [vmem:[%s253_s26] sm:$0xff]  ;;  %1743 = vmatprep.mubr.msk.bf16.mxu1 %vm1839_vm0, %v1837_v5  ;;  %vm791_vm6 = vcmask 891904   ;;  %vm920_vm7 = vcmask 883712   ;;  %vm1049_vm8 = vcmask 752640   ;;  %s1801_s13 = smul.u32 12, %s2062_s22 }
   0xf   : > { %v264_v9 = vld [vmem:[%s253_s26] sm:$0x3f]  ;;  %v270_v11 = vcombine.high %v266_v8, %v266_v8  ;;  %v1691_v58 = vld [vmem:[%s2055_s1 + $0x6] sm:$0x3]  ;;  %vm1178_vm9 = vcmask 744448   ;;  %vm1307_vm10 = vcmask 736256  }
  0x10   : > { %v276_v7 = vsub.s32 %v273_v4, %v1895_v3  ;;  %v395_v13 = vcombine.high %v264_v9, %v264_v9  ;;  %v265_v38 = vld [vmem:[%s2055_s1] sm:$0x3]  ;;  %v1687_v48 = vld [vmem:[%s2055_s1 + $0x4] sm:$0x3]  ;;  %vm1528_vm11 = vcmask 1043456   ;;  %s258_s16 = scalar_lea.vmem %s2059_s5, %s1801_s13  ;;  %s1802_s17 = smul.u32 3, %s2062_s22 }
  0x11   : > { %vm1583_vm12 = vcmp.lt.s32.totalorder %v274_v0, 384 }
  0x12   : > { %v277_v10 = vrot.slane %v266_v8, %v276_v7  ;;  %v1908_v12 = vrot.slane %v264_v9, %v276_v7  ;;  %v284_v15 = vrot.slane %v270_v11, %v276_v7  ;;  %v1910_v16 = vrot.slane %v395_v13, %v276_v7  ;;  %v1695_v8 = vld [vmem:[%s2055_s1 + $0x8] sm:$0x3]  ;;  %s262_s20 = scalar_lea.vmem %s2060_s6, %s1802_s17 }
  0x14   : > { %287 = vrot.lane.b32.xlu0 %v277_v10, %s1840_s27  ;;  %v285_v14 = vcombine.high %v277_v10, %v277_v10  ;;  %291 = vrot.lane.b32.xlu1 %v284_v15, %s1840_s27  ;;  %v286_v17 = vcombine.high %v284_v15, %v284_v15  ;;  %v410_v22 = vcombine.high %v1908_v12, %v1908_v12  ;;  %v415_v31 = vsel %vm303_vm2, %v1908_v12, 0 }
  0x15   : > { %v421_v33 = vsel %vm303_vm2, %v1910_v16, 0 }
  0x18   : > { %289 = vrot.lane.b32.xlu0 %v285_v14, %s1840_s27  ;;  %293 = vrot.lane.b32.xlu1 %v286_v17, %s1840_s27 }
  0x1c   : > { %525 = vrot.lane.b32.xlu0 %v277_v10, %s1841_s28  ;;  %527 = vrot.lane.b32.xlu1 %v285_v14, %s1841_s28 }
  0x20   : > { %529 = vrot.lane.b32.xlu0 %v284_v15, %s1841_s28  ;;  %531 = vrot.lane.b32.xlu1 %v286_v17, %s1841_s28 }
  0x24   : > { %654 = vrot.lane.b32.xlu0 %v277_v10, %s1842_s29  ;;  %656 = vrot.lane.b32.xlu1 %v285_v14, %s1842_s29 }
  0x28   : > { %658 = vrot.lane.b32.xlu0 %v284_v15, %s1842_s29  ;;  %660 = vrot.lane.b32.xlu1 %v286_v17, %s1842_s29 }
  0x2c   : > { %783 = vrot.lane.b32.xlu0 %v277_v10, %s1843_s30  ;;  %785 = vrot.lane.b32.xlu1 %v285_v14, %s1843_s30 }
  0x30   : > { %787 = vrot.lane.b32.xlu0 %v284_v15, %s1843_s30  ;;  %789 = vrot.lane.b32.xlu1 %v286_v17, %s1843_s30 }
  0x34   : > { %912 = vrot.lane.b32.xlu0 %v277_v10, %s1844_s7  ;;  %914 = vrot.lane.b32.xlu1 %v285_v14, %s1844_s7 }
  0x38   : > { %916 = vrot.lane.b32.xlu0 %v284_v15, %s1844_s7  ;;  %918 = vrot.lane.b32.xlu1 %v286_v17, %s1844_s7 }
  0x3c   : > { %1041 = vrot.lane.b32.xlu0 %v277_v10, %s1845_s8  ;;  %1043 = vrot.lane.b32.xlu1 %v285_v14, %s1845_s8 }
  0x40   : > { %1045 = vrot.lane.b32.xlu0 %v284_v15, %s1845_s8  ;;  %1047 = vrot.lane.b32.xlu1 %v286_v17, %s1845_s8 }
  0x44   : > { %1170 = vrot.lane.b32.xlu0 %v277_v10, %s1846_s9  ;;  %1172 = vrot.lane.b32.xlu1 %v285_v14, %s1846_s9 }
  0x48   : > { %1174 = vrot.lane.b32.xlu0 %v284_v15, %s1846_s9  ;;  %1176 = vrot.lane.b32.xlu1 %v286_v17, %s1846_s9 }
  0x4c   : > { %1299 = vrot.lane.b32.xlu0 %v277_v10, %s1847_s10  ;;  %1301 = vrot.lane.b32.xlu1 %v285_v14, %s1847_s10 }
  0x50   : > { %1303 = vrot.lane.b32.xlu0 %v284_v15, %s1847_s10  ;;  %1305 = vrot.lane.b32.xlu1 %v286_v17, %s1847_s10 }
  0x54   : > { %1410 = vperm.xlu0 %1824, %v1407_v18   ;;  %v1699_v18 = vld [vmem:[%s2055_s1 + $0xa] sm:$0x3] }
  0x86   : > { %v288_v19 = vpop.permute.xlu0 %287  ;;  %v292_v20 = vpop.permute.xlu1 %291 }
  0x8a   : > { %v290_v21 = vpop.permute.xlu0 %289  ;;  %v294_v25 = vpop.permute.xlu1 %293 }
  0x8b   : > { %v297_v23 = vsel %vm295_vm1, %v290_v21, %v292_v20  ;;  %v296_v24 = vsel %vm295_vm1, %v288_v19, %v290_v21  ;;  %v298_v27 = vsel %vm295_vm1, %v292_v20, %v294_v25 }
  0x8c   : > { %1681 = vmatprep.subr.msk.bf16.mxu0 %vm303_vm2, %v297_v23  ;;  %v305_v26 = vsel %vm303_vm2, %v296_v24, 0  ;;  %v311_v29 = vsel %vm303_vm2, %v298_v27, 0 }
  0x8d   : > { %328 = vmatpush1.bf16.msra.mxu0 %v305_v26  ;;  %1742 = vmatpush3.bf16.msra.mxu1 %v311_v29 }
  0x8e   : > { %v526_v30 = vpop.permute.xlu0 %525  ;;  %1684 = vmatprep.subr.msk.bf16.mxu0 %vm303_vm2, %v410_v22  ;;  %1747 = vmatprep.subr.bf16.mxu1 %v1837_v5  ;;  %v528_v32 = vpop.permute.xlu1 %527 }
  0x8f   : > { %v534_v35 = vsel %vm533_vm4, %v526_v30, %v528_v32 }
  0x90   : > { %1682 = vmatmul.mubr.msk.bf16.vlgmr.msra.gmra.mxu0 %vm299_vm3, %v1680_v28  ;;  %1744 = vmatmul.mubr.msk.bf16.vlgmr.msra.gmra.mxu1 %vm299_vm3, %v1680_v28  ;;  %v541_v40 = vsel %vm303_vm2, %v534_v35, 0  ;;  %v1703_v28 = vld [vmem:[%s2055_s1 + $0xc] sm:$0x3] }
  0x91   : > { %438 = vmatpush1.bf16.msra.mxu0 %v415_v31  ;;  %455 = vmatprep.mubr.bf16.mxu0 %v1838_v6 }
  0x92   : > { %v530_v34 = vpop.permute.xlu0 %529  ;;  %1748 = vmatpush3.bf16.msra.mxu1 %v421_v33  ;;  %1749 = vmatprep.mubr.msk.bf16.mxu1 %vm1839_vm0, %v1837_v5  ;;  %v532_v37 = vpop.permute.xlu1 %531 }
  0x93   : > { %v535_v36 = vsel %vm533_vm4, %v528_v32, %v530_v34  ;;  %1753 = vmatprep.subr.bf16.mxu1 %v1837_v5  ;;  %v536_v39 = vsel %vm533_vm4, %v530_v34, %v532_v37 }
  0x94   : > { %1688 = vmatprep.subr.msk.bf16.mxu0 %vm303_vm2, %v535_v36  ;;  %v547_v42 = vsel %vm303_vm2, %v536_v39, 0 }
  0x96   : > { %v655_v41 = vpop.permute.xlu0 %654  ;;  %v657_v43 = vpop.permute.xlu1 %656 }
  0x97   : > { %v663_v45 = vsel %vm662_vm5, %v655_v41, %v657_v43 }
  0x98   : > { %1685 = vmatmul.mubr.msk.bf16.vlgmr.msra.gmra.mxu0 %vm299_vm3, %v265_v38  ;;  %1750 = vmatmul.mubr.msk.bf16.vlgmr.msra.gmra.mxu1 %vm299_vm3, %v265_v38  ;;  %v670_v50 = vsel %vm303_vm2, %v663_v45, 0  ;;  %v1707_v38 = vld [vmem:[%s2055_s1 + $0xe] sm:$0x3] }
  0x99   : > { %564 = vmatpush1.bf16.msra.mxu0 %v541_v40  ;;  %581 = vmatprep.mubr.bf16.mxu0 %v1838_v6 }
  0x9a   : > { %v659_v44 = vpop.permute.xlu0 %658  ;;  %1754 = vmatpush3.bf16.msra.mxu1 %v547_v42  ;;  %1755 = vmatprep.mubr.msk.bf16.mxu1 %vm1839_vm0, %v1837_v5  ;;  %v661_v47 = vpop.permute.xlu1 %660  ;;  %v1711_v42 = vld [vmem:[%s2055_s1 + $0x10] sm:$0x3] }
  0x9b   : > { %v664_v46 = vsel %vm662_vm5, %v657_v43, %v659_v44  ;;  %1759 = vmatprep.subr.bf16.mxu1 %v1837_v5  ;;  %v665_v49 = vsel %vm662_vm5, %v659_v44, %v661_v47  ;;  %v1423_v43 = vld [vmem:[%s2058_s4] sm:$0xf] }
  0x9c   : > { %1692 = vmatprep.subr.msk.bf16.mxu0 %vm303_vm2, %v664_v46  ;;  %v676_v52 = vsel %vm303_vm2, %v665_v49, 0  ;;  %1426 = vperm.xlu1 %1825, %v1423_v43  }
  0x9e   : > { %v784_v51 = vpop.permute.xlu0 %783  ;;  %v786_v53 = vpop.permute.xlu1 %785 }
  0x9f   : > { %v792_v55 = vsel %vm791_vm6, %v784_v51, %v786_v53 }
  0xa0   : > { %1689 = vmatmul.mubr.msk.bf16.vlgmr.msra.gmra.mxu0 %vm299_vm3, %v1687_v48  ;;  %1756 = vmatmul.mubr.msk.bf16.vlgmr.msra.gmra.mxu1 %vm299_vm3, %v1687_v48  ;;  %v799_v60 = vsel %vm303_vm2, %v792_v55, 0 }
  0xa1   : > { %693 = vmatpush1.bf16.msra.mxu0 %v670_v50  ;;  %710 = vmatprep.mubr.bf16.mxu0 %v1838_v6 }
  0xa2   : > { %v788_v54 = vpop.permute.xlu0 %787  ;;  %1760 = vmatpush3.bf16.msra.mxu1 %v676_v52  ;;  %1761 = vmatprep.mubr.msk.bf16.mxu1 %vm1839_vm0, %v1837_v5  ;;  %v790_v57 = vpop.permute.xlu1 %789 }
  0xa3   : > { %v793_v56 = vsel %vm791_vm6, %v786_v53, %v788_v54  ;;  %1765 = vmatprep.subr.bf16.mxu1 %v1837_v5  ;;  %v794_v59 = vsel %vm791_vm6, %v788_v54, %v790_v57 }
  0xa4   : > { %1696 = vmatprep.subr.msk.bf16.mxu0 %vm303_vm2, %v793_v56  ;;  %v805_v62 = vsel %vm303_vm2, %v794_v59, 0 }
  0xa6   : > { %v913_v61 = vpop.permute.xlu0 %912  ;;  %v915_v63 = vpop.permute.xlu1 %914 }
  0xa7   : > { %v921_v2 = vsel %vm920_vm7, %v913_v61, %v915_v63 }
  0xa8   : > { %1693 = vmatmul.mubr.msk.bf16.vlgmr.msra.gmra.mxu0 %vm299_vm3, %v1691_v58  ;;  %1762 = vmatmul.mubr.msk.bf16.vlgmr.msra.gmra.mxu1 %vm299_vm3, %v1691_v58  ;;  %v928_v10 = vsel %vm303_vm2, %v921_v2, 0 }
  0xa9   : > { %822 = vmatpush1.bf16.msra.mxu0 %v799_v60  ;;  %839 = vmatprep.mubr.bf16.mxu0 %v1838_v6 }
  0xaa   : > { %v917_v1 = vpop.permute.xlu0 %916  ;;  %1766 = vmatpush3.bf16.msra.mxu1 %v805_v62  ;;  %1767 = vmatprep.mubr.msk.bf16.mxu1 %vm1839_vm0, %v1837_v5  ;;  %v919_v7 = vpop.permute.xlu1 %918 }
  0xab   : > { %v922_v4 = vsel %vm920_vm7, %v915_v63, %v917_v1  ;;  %1771 = vmatprep.subr.bf16.mxu1 %v1837_v5  ;;  %v923_v9 = vsel %vm920_vm7, %v917_v1, %v919_v7 }
  0xac   : > { %1700 = vmatprep.subr.msk.bf16.mxu0 %vm303_vm2, %v922_v4  ;;  %v934_v12 = vsel %vm303_vm2, %v923_v9, 0 }
  0xae   : > { %v1042_v11 = vpop.permute.xlu0 %1041  ;;  %v1044_v13 = vpop.permute.xlu1 %1043 }
  0xaf   : > { %v1050_v15 = vsel %vm1049_vm8, %v1042_v11, %v1044_v13 }
  0xb0   : > { %1697 = vmatmul.mubr.msk.bf16.vlgmr.msra.gmra.mxu0 %vm299_vm3, %v1695_v8  ;;  %1768 = vmatmul.mubr.msk.bf16.vlgmr.msra.gmra.mxu1 %vm299_vm3, %v1695_v8  ;;  %v1057_v20 = vsel %vm303_vm2, %v1050_v15, 0 }
  0xb1   : > { %951 = vmatpush1.bf16.msra.mxu0 %v928_v10  ;;  %968 = vmatprep.mubr.bf16.mxu0 %v1838_v6 }
  0xb2   : > { %v1046_v14 = vpop.permute.xlu0 %1045  ;;  %1772 = vmatpush3.bf16.msra.mxu1 %v934_v12  ;;  %1773 = vmatprep.mubr.msk.bf16.mxu1 %vm1839_vm0, %v1837_v5  ;;  %v1048_v17 = vpop.permute.xlu1 %1047 }
  0xb3   : > { %v1051_v16 = vsel %vm1049_vm8, %v1044_v13, %v1046_v14  ;;  %1777 = vmatprep.subr.bf16.mxu1 %v1837_v5  ;;  %v1052_v19 = vsel %vm1049_vm8, %v1046_v14, %v1048_v17 }
  0xb4   : > { %1704 = vmatprep.subr.msk.bf16.mxu0 %vm303_vm2, %v1051_v16  ;;  %v1063_v22 = vsel %vm303_vm2, %v1052_v19, 0 }
  0xb6   : > { %v1171_v21 = vpop.permute.xlu0 %1170  ;;  %v1173_v23 = vpop.permute.xlu1 %1172 }
  0xb7   : > { %v1179_v25 = vsel %vm1178_vm9, %v1171_v21, %v1173_v23 }
  0xb8   : > { %1701 = vmatmul.mubr.msk.bf16.vlgmr.msra.gmra.mxu0 %vm299_vm3, %v1699_v18  ;;  %1774 = vmatmul.mubr.msk.bf16.vlgmr.msra.gmra.mxu1 %vm299_vm3, %v1699_v18  ;;  %v1186_v30 = vsel %vm303_vm2, %v1179_v25, 0 }
  0xb9   : > { %1080 = vmatpush1.bf16.msra.mxu0 %v1057_v20  ;;  %1097 = vmatprep.mubr.bf16.mxu0 %v1838_v6 }
  0xba   : > { %v1175_v24 = vpop.permute.xlu0 %1174  ;;  %1778 = vmatpush3.bf16.msra.mxu1 %v1063_v22  ;;  %1779 = vmatprep.mubr.msk.bf16.mxu1 %vm1839_vm0, %v1837_v5  ;;  %v1177_v27 = vpop.permute.xlu1 %1176 }
  0xbb   : > { %v1180_v26 = vsel %vm1178_vm9, %v1173_v23, %v1175_v24  ;;  %1783 = vmatprep.subr.bf16.mxu1 %v1837_v5  ;;  %v1181_v29 = vsel %vm1178_vm9, %v1175_v24, %v1177_v27 }
  0xbc   : > { %1708 = vmatprep.subr.msk.bf16.mxu0 %vm303_vm2, %v1180_v26  ;;  %v1192_v32 = vsel %vm303_vm2, %v1181_v29, 0 }
  0xbe   : > { %v1300_v31 = vpop.permute.xlu0 %1299  ;;  %v1302_v33 = vpop.permute.xlu1 %1301 }
  0xbf   : > { %v1308_v35 = vsel %vm1307_vm10, %v1300_v31, %v1302_v33 }
  0xc0   : > { %1705 = vmatmul.mubr.msk.bf16.vlgmr.msra.gmra.mxu0 %vm299_vm3, %v1703_v28  ;;  %1780 = vmatmul.mubr.msk.bf16.vlgmr.msra.gmra.mxu1 %vm299_vm3, %v1703_v28  ;;  %v1315_v40 = vsel %vm303_vm2, %v1308_v35, 0 }
  0xc1   : > { %1209 = vmatpush1.bf16.msra.mxu0 %v1186_v30  ;;  %1226 = vmatprep.mubr.bf16.mxu0 %v1838_v6 }
  0xc2   : > { %v1304_v34 = vpop.permute.xlu0 %1303  ;;  %1784 = vmatpush3.bf16.msra.mxu1 %v1192_v32  ;;  %1785 = vmatprep.mubr.msk.bf16.mxu1 %vm1839_vm0, %v1837_v5  ;;  %v1306_v37 = vpop.permute.xlu1 %1305 }
  0xc3   : > { %v1309_v36 = vsel %vm1307_vm10, %v1302_v33, %v1304_v34  ;;  %1789 = vmatprep.subr.bf16.mxu1 %v1837_v5  ;;  %v1310_v39 = vsel %vm1307_vm10, %v1304_v34, %v1306_v37 }
  0xc4   : > { %1712 = vmatprep.subr.msk.bf16.mxu0 %vm303_vm2, %v1309_v36  ;;  %v1321_v41 = vsel %vm303_vm2, %v1310_v39, 0 }
  0xc8   : > { %1709 = vmatmul.mubr.msk.bf16.vlgmr.msra.gmra.mxu0 %vm299_vm3, %v1707_v38  ;;  %1786 = vmatmul.mubr.msk.bf16.vlgmr.msra.gmra.mxu1 %vm299_vm3, %v1707_v38 }
  0xc9   : > { %1338 = vmatpush1.bf16.msra.mxu0 %v1315_v40  ;;  %1355 = vmatprep.mubr.bf16.mxu0 %v1838_v6 }
  0xca   : > { %1790 = vmatpush3.bf16.msra.mxu1 %v1321_v41  ;;  %1791 = vmatprep.mubr.msk.bf16.mxu1 %vm1839_vm0, %v1837_v5 }
  0xcb   : > { %1795 = vmatprep.subr.bf16.mxu1 %v1837_v5 }
  0xd0   : > { %1713 = vmatmul.mubr.msk.bf16.vlgmr.msra.gmra.mxu0 %vm299_vm3, %v1711_v42  ;;  %1792 = vmatmul.mubr.msk.bf16.vlgmr.msra.gmra.mxu1 %vm299_vm3, %v1711_v42 }
  0xd1   : > { %1473 = vmatprep.mubr.bf16.mxu0 %v1838_v6  ;;  %1797 = vmatprep.mubr.msk.bf16.mxu1 %vm1839_vm0, %v1837_v5 }
 0x150   : > { %v347_v44 = vpop.f32.mrf.mxu0  ;;  %v388_v46 = vpop.f32.mrf.mxu1 }
 0x152   : > { %v349_v45 = vpop.f32.mrf.mxu0  ;;  %v1745_v48 = vpop.f32.mrf.mxu1 }
 0x154   : > { %v351_v47 = vpop.f32.mrf.mxu0  ;;  %v391_v50 = vpop.f32.mrf.mxu1 }
 0x156   : > { %v352_v49 = vpop.f32.mrf.mxu0  ;;  %v1746_v51 = vpop.f32.mrf.mxu1 }
 0x158   : > { %v457_v52 = vpop.f32.mrf.mxu0  ;;  %v498_v53 = vpop.f32.mrf.mxu1 }
 0x159   : > { %v458_v33 = vadd.f32 %v457_v52, %v347_v44  ;;  %v499_v37 = vadd.f32 %v498_v53, %v388_v46 }
 0x15a   : > { %v459_v6 = vpop.f32.mrf.mxu0  ;;  %v1751_v55 = vpop.f32.mrf.mxu1 }
 0x15b   : > { %v460_v36 = vadd.f32 %v459_v6, %v349_v45 }
 0x15c   : > { %v461_v54 = vpop.f32.mrf.mxu0  ;;  %v501_v5 = vpop.f32.mrf.mxu1 }
 0x15e   : > { %v462_v56 = vpop.f32.mrf.mxu0  ;;  %v1752_v57 = vpop.f32.mrf.mxu1 }
 0x160   : > { %v583_v58 = vpop.f32.mrf.mxu0  ;;  %v624_v60 = vpop.f32.mrf.mxu1 }
 0x161   : > { %v630_v38 = vadd.f32 %v583_v58, %v458_v33  ;;  %v632_v42 = vadd.f32 %v624_v60, %v499_v37 }
 0x162   : > { %v585_v59 = vpop.f32.mrf.mxu0  ;;  %v1757_v62 = vpop.f32.mrf.mxu1 }
 0x163   : > { %v631_v41 = vadd.f32 %v585_v59, %v460_v36  ;;  %v1411_v62 = vpop.permute.xlu0 %1410 }
 0x164   : > { %v587_v61 = vpop.f32.mrf.mxu0  ;;  %v627_v1 = vpop.f32.mrf.mxu1 }
 0x166   : > { %v588_v63 = vpop.f32.mrf.mxu0  ;;  %v1758_v2 = vpop.f32.mrf.mxu1 }
 0x168   : > { %v712_v4 = vpop.f32.mrf.mxu0  ;;  %v753_v8 = vpop.f32.mrf.mxu1 }
 0x169   : > { %v759_v43 = vadd.f32 %v712_v4, %v630_v38  ;;  %v761_v50 = vadd.f32 %v753_v8, %v632_v42 }
 0x16a   : > { %v714_v7 = vpop.f32.mrf.mxu0  ;;  %v1763_v10 = vpop.f32.mrf.mxu1 }
 0x16b   : > { %v760_v49 = vadd.f32 %v714_v7, %v631_v41 }
 0x16c   : > { %v716_v9 = vpop.f32.mrf.mxu0  ;;  %v756_v12 = vpop.f32.mrf.mxu1 }
 0x16e   : > { %v717_v11 = vpop.f32.mrf.mxu0  ;;  %v1764_v13 = vpop.f32.mrf.mxu1 }
 0x170   : > { %v841_v14 = vpop.f32.mrf.mxu0  ;;  %v882_v16 = vpop.f32.mrf.mxu1 }
 0x171   : > { %v888_v51 = vadd.f32 %v841_v14, %v759_v43  ;;  %v890_v5 = vadd.f32 %v882_v16, %v761_v50 }
 0x172   : > { %v843_v15 = vpop.f32.mrf.mxu0  ;;  %v1769_v18 = vpop.f32.mrf.mxu1 }
 0x173   : > { %v889_v56 = vadd.f32 %v843_v15, %v760_v49 }
 0x174   : > { %v845_v17 = vpop.f32.mrf.mxu0  ;;  %v885_v20 = vpop.f32.mrf.mxu1 }
 0x176   : > { %v846_v19 = vpop.f32.mrf.mxu0  ;;  %v1770_v21 = vpop.f32.mrf.mxu1 }
 0x178   : > { %v970_v22 = vpop.f32.mrf.mxu0  ;;  %v1011_v24 = vpop.f32.mrf.mxu1 }
 0x179   : > { %v1017_v44 = vadd.f32 %v970_v22, %v888_v51  ;;  %v1019_v46 = vadd.f32 %v1011_v24, %v890_v5 }
 0x17a   : > { %v972_v23 = vpop.f32.mrf.mxu0  ;;  %v1775_v26 = vpop.f32.mrf.mxu1 }
 0x17b   : > { %v1018_v45 = vadd.f32 %v972_v23, %v889_v56 }
 0x17c   : > { %v974_v25 = vpop.f32.mrf.mxu0  ;;  %v1014_v28 = vpop.f32.mrf.mxu1 }
 0x17d   : > { %v1419_v28 = vld [vmem:[%s2057_s3] sm:$0x3] }
 0x17e   : > { %v975_v27 = vpop.f32.mrf.mxu0  ;;  %v1776_v29 = vpop.f32.mrf.mxu1 }
 0x17f   : > { %v1427_v29 = vpop.permute.xlu1 %1426 }
 0x180   : > { %v1099_v30 = vpop.f32.mrf.mxu0  ;;  %v1140_v32 = vpop.f32.mrf.mxu1 }
 0x181   : > { %v1146_v6 = vadd.f32 %v1099_v30, %v1017_v44  ;;  %v1148_v60 = vadd.f32 %v1140_v32, %v1019_v46 }
 0x182   : > { %v1101_v31 = vpop.f32.mrf.mxu0  ;;  %v1781_v35 = vpop.f32.mrf.mxu1 }
 0x183   : > { %v1147_v59 = vadd.f32 %v1101_v31, %v1018_v45 }
 0x184   : > { %v1103_v34 = vpop.f32.mrf.mxu0  ;;  %v1143_v40 = vpop.f32.mrf.mxu1 }
 0x186   : > { %v1104_v39 = vpop.f32.mrf.mxu0  ;;  %v1782_v47 = vpop.f32.mrf.mxu1 }
 0x188   : > { %v1228_v48 = vpop.f32.mrf.mxu0  ;;  %v1269_v55 = vpop.f32.mrf.mxu1 }
 0x189   : > { %v1275_v61 = vadd.f32 %v1228_v48, %v1146_v6  ;;  %v1277_v4 = vadd.f32 %v1269_v55, %v1148_v60 }
 0x18a   : > { %v1230_v54 = vpop.f32.mrf.mxu0  ;;  %v1787_v57 = vpop.f32.mrf.mxu1 }
 0x18b   : > { %v1276_v2 = vadd.f32 %v1230_v54, %v1147_v59  ;;  %v1848_v57 = vmov 1966171168  }
 0x18c   : > { %v1232_v52 = vpop.f32.mrf.mxu0  ;;  %v1272_v58 = vpop.f32.mrf.mxu1  ;;  %v1559_v45 = vunpack.c.l.s4 %v1848_v57 }
 0x18e   : > { %v1233_v53 = vpop.f32.mrf.mxu0  ;;  %v1788_v63 = vpop.f32.mrf.mxu1 }
 0x190   : > { %v1357_v1 = vpop.f32.mrf.mxu0  ;;  %v1398_v9 = vpop.f32.mrf.mxu1 }
 0x191   : > { %v1404_v7 = vadd.f32 %v1357_v1, %v1275_v61  ;;  %v1406_v12 = vadd.f32 %v1398_v9, %v1277_v4  ;;  %v1560_v61 = vunpack.c.0.s8 %v1559_v45 }
 0x192   : > { %v1359_v8 = vpop.f32.mrf.mxu0  ;;  %v1793_v14 = vpop.f32.mrf.mxu1 }
 0x193   : > { %v1413_v10 = vadd.f32 %v1411_v62, %v1404_v7  ;;  %v1405_v11 = vadd.f32 %v1359_v8, %v1276_v2  ;;  %v1415_v17 = vadd.f32 %v1411_v62, %v1406_v12  ;;  %v1563_v4 = vsub.s32 %v1560_v61, %v1895_v3 }
 0x194   : > { %v1361_v13 = vpop.f32.mrf.mxu0  ;;  %v1401_v19 = vpop.f32.mrf.mxu1 }
 0x195   : > { %v1416_v15 = vmax.f32 %v1413_v10, 0.0  ;;  %v1414_v16 = vadd.f32 %v1411_v62, %v1405_v11  ;;  %v1418_v22 = vmax.f32 %v1415_v17, 0.0 }
 0x196   : > { %v1362_v18 = vpop.f32.mrf.mxu0  ;;  %v1794_v23 = vpop.f32.mrf.mxu1 }
 0x197   : > { %v1420_v20 = vpack.c.bf16 %v1416_v15, %v1416_v15  ;;  %v1417_v21 = vmax.f32 %v1414_v16, 0.0  ;;  %v1422_v25 = vpack.c.bf16 %v1418_v22, %v1418_v22 }
 0x199   : > { %v1421_v24 = vpack.c.bf16 %v1417_v21, %v1417_v21  ;;  %v1433_v26 = vsel %vm303_vm2, %v1420_v20, 0  ;;  %v1439_v27 = vsel %vm303_vm2, %v1422_v25, 0 }
 0x19a   : > { %1796 = vmatpush3.bf16.msra.mxu1 %v1439_v27 }
 0x19b   : > { %1715 = vmatprep.subr.msk.bf16.mxu0 %vm303_vm2, %v1421_v24 }
 0x19c   : > { %1456 = vmatpush1.bf16.msra.mxu0 %v1433_v26 }
 0x19d   : > { %1798 = vmatmul.mubr.msk.bf16.vlgmr.msra.gmra.mxu1 %vm299_vm3, %v1419_v28 }
 0x19f   : > { %1716 = vmatmul.mubr.msk.bf16.vlgmr.msra.gmra.mxu0 %vm299_vm3, %v1419_v28 }
 0x25d   : > { %v1516_v31 = vpop.f32.mrf.mxu1 }
 0x25e   : > { %v1517_v33 = vadd.f32 %v1516_v31, %v1427_v29 }
 0x25f   : > { %v1475_v30 = vpop.f32.mrf.mxu0  ;;  %v1799_v35 = vpop.f32.mrf.mxu1 }
 0x260   : > { %v1476_v32 = vadd.f32 %v1475_v30, %v1427_v29  ;;  %1527 = vst [vmem:[%s258_s16 + $0x8] sm:$0xf] %v1517_v33  ;;  %v1543_v37 = vsel %vm1528_vm11, %v1517_v33, 0.0 }
 0x261   : > { %v1477_v34 = vpop.f32.mrf.mxu0  ;;  %v1544_v40 = vrot.slane %v1543_v37, 4  ;;  %v1519_v42 = vpop.f32.mrf.mxu1 }
 0x262   : > { %v1529_v36 = vsel %vm1528_vm11, %v1476_v32, 0.0  ;;  %v1478_v38 = vadd.f32 %v1477_v34, %v1427_v29 }
 0x263   : > { %v1530_v39 = vrot.slane %v1529_v36, 4  ;;  %v1479_v41 = vpop.f32.mrf.mxu0  ;;  %v1545_v49 = vadd.f32 %v1544_v40, %v1543_v37  ;;  %v1800_v54 = vpop.f32.mrf.mxu1 }
 0x264   : > { %v1524_v43 = vcombine.low %v1476_v32, %v1478_v38  ;;  %v1536_v47 = vsel %vm1528_vm11, %v1478_v38, 0.0 }
 0x265   : > { %v1531_v48 = vadd.f32 %v1530_v39, %v1529_v36  ;;  %v1537_v50 = vrot.slane %v1536_v47, 4  ;;  %v1480_v51 = vpop.f32.mrf.mxu0  ;;  %v1546_v56 = vrot.slane %v1545_v49, 2 }
 0x266   : > { %1526 = vst [vmem:[%s258_s16] sm:$0xff] %v1524_v43 }
 0x267   : > { %v1532_v55 = vrot.slane %v1531_v48, 2  ;;  %v1538_v5 = vadd.f32 %v1537_v50, %v1536_v47  ;;  %v1547_v52 = vadd.f32 %v1546_v56, %v1545_v49 }
 0x269   : > { %v1533_v44 = vadd.f32 %v1532_v55, %v1531_v48  ;;  %v1539_v46 = vrot.slane %v1538_v5, 2  ;;  %v1548_v53 = vrot.slane %v1547_v52, 1 }
 0x26b   : > { %v1534_v6 = vrot.slane %v1533_v44, 1  ;;  %v1540_v58 = vadd.f32 %v1539_v46, %v1538_v5  ;;  %v1549_v60 = vadd.f32 %v1548_v53, %v1547_v52 }
 0x26d   : > { %v1535_v59 = vadd.f32 %v1534_v6, %v1533_v44  ;;  %v1541_v62 = vrot.slane %v1540_v58, 1  ;;  %v1553_v2 = vmul.f32 0.25, %v1549_v60 }
 0x26f   : > { %v1542_v63 = vadd.f32 %v1541_v62, %v1540_v58  ;;  %v1551_v1 = vmul.f32 0.25, %v1535_v59  ;;  %v1571_v9 = vrot.slane %v1553_v2, %v1563_v4 }
 0x271   : > { %v1552_v7 = vmul.f32 0.25, %v1542_v63 }
 0x273   : > { %v1557_v8 = vcombine.low %v1551_v1, %v1552_v7 }
 0x275   : > { %v1564_v10 = vrot.slane %v1557_v8, %v1563_v4 }
 0x277   : > { %v1572_v11 = vcombine.low %v1564_v10, %v1571_v9 }
 0x279   : > { %v1579_v12 = vrot.slane %v1572_v11, %v1563_v4 }
 0x27b   : > { %1585 = vst.msk [vmem:[%s262_s20] sm:$0x7] %vm1583_vm12, %v1579_v12 }
 0x27c PF: > { %s17_s21 = sadd.s32 1, %s1834_s21  }
 0x27d   : > { %p14_p4 = scmp.ge.s32.totalorder %s17_s21, 4  }
 0x27f   :  { %16 = sbr.rel (!%p14_p4) target bundleno = 1 (0x1), region = 90 }

</bundles_post_ra>
